<compile_context>
chip_gen: v6e
topology: v6e:2x2x1
jax: 0.10.0
libtpu: 0.0.40
codegen_flags: <defaults>
</compile_context>

<pallas_src>
import functools
import math

import jax
import jax.numpy as jnp
from jax import lax
from jax.experimental import pallas as pl
from jax.experimental.pallas import tpu as pltpu


def _layer_norm(x, gamma, beta, eps=1e-5):
    mean = jnp.mean(x, axis=-1, keepdims=True)
    var = jnp.mean((x - mean) ** 2, axis=-1, keepdims=True)
    return (x - mean) * lax.rsqrt(var + eps) * gamma + beta


def _pick_seq_tile(T):
    # Largest of 256/128 that divides T, otherwise the full sequence.
    for t in (256, 128):
        if T > t and T % t == 0:
            return t
    return T


def _pick_batch_block(B, T, target_rows=512):
    bb = max(1, min(B, max(1, target_rows // max(T, 1))))
    while B % bb:
        bb -= 1
    return bb


def _vmem_limit_bytes(Bb, T, D, F, H):
    """Rough VMEM budget for the tile set, with headroom."""
    M = Bb * T
    hd = D // H
    TQ = _pick_seq_tile(T)
    weights = 2 * 2 * (4 * D * D + 2 * D * F)          # bf16 weights, double-buffered
    vectors = 2 * 4 * (9 * D + F)                      # packed vectors + b1
    io = 2 * (M * D * 2) + 2 * (M * D * 4)             # x block (bf16) + o block (f32)
    acts = 4 * (6 * M * D + 2 * M * F)                 # f32 activation temporaries
    attn = 4 * (3 * Bb * H * TQ * TQ + 4 * Bb * H * T * hd)
    total = weights + vectors + io + acts + attn
    return int(min(max(total * 1.3, 32 * 1024 * 1024), 100 * 1024 * 1024))


def decoder_kernel(x_ref, vecs_ref, b1_ref,
                   wq_ref, wk_ref, wv_ref, wo_ref, w1_ref, w2_ref,
                   o_ref, *, num_heads):
    """One (batch block, layer) grid step of the fused decoder stack."""
    l = pl.program_id(1)

    # Layer 0 of this batch block: pull the embedded inputs (bf16 in HBM) into
    # the VMEM-resident output block, which doubles as the f32 hidden-state
    # accumulator for the whole layer sweep (no separate scratch buffer).
    @pl.when(l == 0)
    def _():
        o_ref[...] = x_ref[...].astype(jnp.float32)

    Bb, T, D = o_ref.shape
    M = Bb * T
    H = num_heads
    hd = D // H
    scale = 1.0 / math.sqrt(hd)

    x = o_ref[...].reshape(M, D)                       # (M, D) f32 hidden state

    vecs = vecs_ref[0]                                 # (9, D) packed per-layer vectors
    ln1_g, ln1_b = vecs[0:1], vecs[1:2]
    bq, bk, bv, bo = vecs[2:3], vecs[3:4], vecs[4:5], vecs[5:6]
    ln2_g, ln2_b = vecs[6:7], vecs[7:8]
    b2 = vecs[8:9]
    b1 = b1_ref[0]                                     # (1, F)

    # --------------- causal multi-head self-attention (pre-LN) ---------------
    xn = _layer_norm(x, ln1_g, ln1_b).astype(jnp.bfloat16)
    # 1/sqrt(hd) folded into q (one cheap (M, D) mul) instead of scaling scores.
    q = (jnp.dot(xn, wq_ref[0], preferred_element_type=jnp.float32) + bq) * scale
    k = jnp.dot(xn, wk_ref[0], preferred_element_type=jnp.float32) + bk
    v = jnp.dot(xn, wv_ref[0], preferred_element_type=jnp.float32) + bv

    BH = Bb * H

    def to_heads(t):
        # (M, D) -> (Bb*H, T, hd): heads become a leading batch dim for a
        # single head-batched dot_general.  Minor (lane) dim is untouched by
        # the transpose; cast to bf16 first to halve relayout bytes.
        return (t.astype(jnp.bfloat16)
                 .reshape(Bb, T, H, hd).transpose(0, 2, 1, 3)
                 .reshape(BH, T, hd))

    qh, kh, vh = to_heads(q), to_heads(k), to_heads(v)

    # Flash-attention style tiling: online softmax over KV tiles; causally
    # fully-masked tiles (ki > qi) are skipped; only the diagonal tile builds
    # a (TQ, TQ) mask.  Live scores bounded to (BH, TQ, TQ) f32.
    TQ = _pick_seq_tile(T)
    nq = T // TQ
    ctx_tiles = []
    for qi in range(nq):
        q_t = qh[:, qi * TQ:(qi + 1) * TQ, :]                   # (BH, TQ, hd)
        m_i = jnp.full((BH, TQ, 1), -jnp.inf, jnp.float32)
        l_i = jnp.zeros((BH, TQ, 1), jnp.float32)
        acc = jnp.zeros((BH, TQ, hd), jnp.float32)
        for ki in range(qi + 1):                                # causal tile skip
            k_t = kh[:, ki * TQ:(ki + 1) * TQ, :]
            v_t = vh[:, ki * TQ:(ki + 1) * TQ, :]
            s = jnp.einsum("bqd,bkd->bqk", q_t, k_t,
                           preferred_element_type=jnp.float32)  # (BH, TQ, TQ) f32
            if ki == qi:   # only the diagonal tile needs masking (f32 scores)
                row = lax.broadcasted_iota(jnp.int32, (TQ, TQ), 0)
                col = lax.broadcasted_iota(jnp.int32, (TQ, TQ), 1)
                s = jnp.where((col <= row)[None, :, :], s, -1e30)
            m_new = jnp.maximum(m_i, jnp.max(s, axis=-1, keepdims=True))
            alpha = jnp.exp(m_i - m_new)
            p = jnp.exp(s - m_new)
            l_i = alpha * l_i + jnp.sum(p, axis=-1, keepdims=True)
            acc = alpha * acc + jnp.einsum("bqk,bkd->bqd",
                                           p.astype(jnp.bfloat16), v_t,
                                           preferred_element_type=jnp.float32)
            m_i = m_new
        ctx_tiles.append(acc * pl.reciprocal(l_i, approx=True))  # EUP slot
    ctx = ctx_tiles[0] if nq == 1 else jnp.concatenate(ctx_tiles, axis=1)

    attn = (ctx.astype(jnp.bfloat16)
               .reshape(Bb, H, T, hd).transpose(0, 2, 1, 3).reshape(M, D))
    attn = jnp.dot(attn, wo_ref[0], preferred_element_type=jnp.float32) + bo
    # attention_dropout / outwards_dropout: identity in eval mode.
    x = x + attn

    # ------------------------------- MLP (pre-LN) ----------------------------
    xn2 = _layer_norm(x, ln2_g, ln2_b).astype(jnp.bfloat16)
    h1 = jnp.dot(xn2, w1_ref[0], preferred_element_type=jnp.float32) + b1
    # TODO(synk): keep the (M, F) intermediate in bf16 on v6e/v7x (bf16 VPU/EUP).
    h1 = jax.nn.gelu(h1, approximate=True)
    h2 = jnp.dot(h1.astype(jnp.bfloat16), w2_ref[0],
                 preferred_element_type=jnp.float32) + b2
    x = x + h2

    o_ref[...] = x.reshape(Bb, T, D)   # written back to HBM when the batch block changes


def decoder_stack(h0, p, num_heads):
    """Run all decoder layers in a single fused pallas_call."""
    B, T, D = h0.shape
    L, _, F = p["w1"].shape
    Bb = _pick_batch_block(B, T)

    def layer_spec(shape):
        nd = len(shape)
        return pl.BlockSpec((1,) + shape, lambda b, l, _nd=nd: (l,) + (0,) * _nd)

    in_specs = [
        pl.BlockSpec((Bb, T, D), lambda b, l: (b, 0, 0)),   # embedded inputs (bf16)
        layer_spec((9, D)),                                 # packed ln/bias vectors
        layer_spec((1, F)),                                 # b1
        layer_spec((D, D)), layer_spec((D, D)),             # Wq, Wk
        layer_spec((D, D)), layer_spec((D, D)),             # Wv, Wo
        layer_spec((D, F)), layer_spec((F, D)),             # W1, W2
    ]
    out_spec = pl.BlockSpec((Bb, T, D), lambda b, l: (b, 0, 0))

    kernel = functools.partial(decoder_kernel, num_heads=num_heads)
    return pl.pallas_call(
        kernel,
        out_shape=jax.ShapeDtypeStruct((B, T, D), jnp.float32),
        grid_spec=pltpu.PrefetchScalarGridSpec(
            num_scalar_prefetch=0,
            grid=(B // Bb, L),                              # layers innermost
            in_specs=in_specs,
            out_specs=out_spec,
        ),
        compiler_params=pltpu.CompilerParams(
            dimension_semantics=("parallel", "arbitrary"),
            vmem_limit_bytes=_vmem_limit_bytes(Bb, T, D, F, num_heads)),
    )(h0, p["vecs"], p["b1"],
      p["wq"], p["wk"], p["wv"], p["wo"], p["w1"], p["w2"])


@functools.partial(jax.jit, static_argnums=2)
def decoder_forward(X, params, num_heads):
    # Embedding gather + position add (glue, plain JAX).
    tok = jnp.take(params["tok_emb"], X, axis=0)        # (B, T, D)
    pos = params["pos_emb"][None, :, :]                 # (1, context_len, D)
    # token_embedding_dropout: identity in eval mode.
    h0 = (tok + pos).astype(jnp.bfloat16)               # bf16 at the kernel boundary
    return decoder_stack(h0, params["stacked"], num_heads)


def init_params(key, *, num_layers, embedding_dim, context_len, vocab_len):
    D = embedding_dim
    F = 4 * D
    L = num_layers
    keys = jax.random.split(key, 13)

    def w(k, shape):
        # bf16 storage (MXU-native, halves weight DMA); (in, out) layout.
        return (0.02 * jax.random.normal(k, shape, jnp.float32)).astype(jnp.bfloat16)

    def vec(k):
        return 0.02 * jax.random.normal(k, (L, 1, D), jnp.float32)

    ones = jnp.ones((L, 1, D), jnp.float32)
    zeros = jnp.zeros((L, 1, D), jnp.float32)
    # Packed per-layer vector bundle (L, 9, D):
    #   rows: ln1_g, ln1_b, bq, bk, bv, bo, ln2_g, ln2_b, b2
    vecs = jnp.concatenate(
        [ones, zeros, vec(keys[8]), vec(keys[9]), vec(keys[10]), vec(keys[11]),
         ones, zeros, vec(keys[12])], axis=1)

    params = {
        "tok_emb": 0.02 * jax.random.normal(keys[0], (vocab_len, D), jnp.float32),
        "pos_emb": 0.02 * jax.random.normal(keys[1], (context_len, D), jnp.float32),
        "stacked": {
            "vecs": vecs,
            "b1": 0.02 * jax.random.normal(keys[7], (L, 1, F), jnp.float32),
            "wq": w(keys[2], (L, D, D)),
            "wk": w(keys[3], (L, D, D)),
            "wv": w(keys[4], (L, D, D)),
            "wo": w(keys[5], (L, D, D)),
            "w1": w(keys[6], (L, D, F)),
            "w2": w(keys[2], (L, F, D)),
        },
    }
    return params


if __name__ == "__main__":
    # Small, forward-consistent shapes.
    num_layers = 2
    embedding_dim = 32
    num_attention_heads = 4
    context_len = 8
    vocab_len = 64
    batch = 2

    key = jax.random.PRNGKey(0)
    pkey, xkey = jax.random.split(key)
    params = init_params(pkey,
                         num_layers=num_layers,
                         embedding_dim=embedding_dim,
                         context_len=context_len,
                         vocab_len=vocab_len)

    # Token ids: (B, context_len) — the forward adds full-length position
    # embeddings, so the sequence length must equal context_len.
    X = jax.random.randint(xkey, (batch, context_len), 0, vocab_len, jnp.int32)

    out = decoder_forward(X, params, num_attention_heads)
    out = jax.block_until_ready(out)
    assert out.shape == (batch, context_len, embedding_dim)
    assert bool(jnp.all(jnp.isfinite(out)))
    print("KERNEL_OK")
</pallas_src>

<mosaic_0001>
module attributes {stable_mosaic.version = 11 : i64} {
  func.func @decoder_kernel(%arg0: i32, %arg1: i32, %arg2: memref<2x8x32xbf16, #tpu.memory_space<vmem>>, %arg3: memref<1x9x32xf32, #tpu.memory_space<vmem>>, %arg4: memref<1x1x128xf32, #tpu.memory_space<vmem>>, %arg5: memref<1x32x32xbf16, #tpu.memory_space<vmem>>, %arg6: memref<1x32x32xbf16, #tpu.memory_space<vmem>>, %arg7: memref<1x32x32xbf16, #tpu.memory_space<vmem>>, %arg8: memref<1x32x32xbf16, #tpu.memory_space<vmem>>, %arg9: memref<1x32x128xbf16, #tpu.memory_space<vmem>>, %arg10: memref<1x128x32xbf16, #tpu.memory_space<vmem>>, %arg11: memref<2x8x32xf32, #tpu.memory_space<vmem>>) attributes {dimension_semantics = [#tpu.dimension_semantics<parallel>, #tpu.dimension_semantics<arbitrary>], iteration_bounds = array<i64: 1, 2>, scalar_prefetch = 0 : i64, scratch_operands = 0 : i64, tpu.core_type = #tpu.core_type<tc>, window_params = [{transform_indices = @transform_0, window_bounds = array<i64: 2, 8, 32>}, {transform_indices = @transform_1, window_bounds = array<i64: 1, 9, 32>}, {transform_indices = @transform_2, window_bounds = array<i64: 1, 1, 128>}, {transform_indices = @transform_3, window_bounds = array<i64: 1, 32, 32>}, {transform_indices = @transform_4, window_bounds = array<i64: 1, 32, 32>}, {transform_indices = @transform_5, window_bounds = array<i64: 1, 32, 32>}, {transform_indices = @transform_6, window_bounds = array<i64: 1, 32, 32>}, {transform_indices = @transform_7, window_bounds = array<i64: 1, 32, 128>}, {transform_indices = @transform_8, window_bounds = array<i64: 1, 128, 32>}, {transform_indices = @transform_9, window_bounds = array<i64: 2, 8, 32>}]} {
    %c0_i32 = arith.constant 0 : i32
    %0 = arith.cmpi eq, %arg1, %c0_i32 : i32
    %1 = arith.extui %0 : i1 to i32
    %c0_i32_0 = arith.constant 0 : i32
    %2 = arith.cmpi ne, %1, %c0_i32_0 : i32
    scf.if %2 {
      %c0_58 = arith.constant 0 : index
      %c0_59 = arith.constant 0 : index
      %c0_60 = arith.constant 0 : index
      %162 = vector.load %arg2[%c0_58, %c0_59, %c0_60] : memref<2x8x32xbf16, #tpu.memory_space<vmem>>, vector<2x8x32xbf16>
      %163 = arith.extf %162 : vector<2x8x32xbf16> to vector<2x8x32xf32>
      %c0_61 = arith.constant 0 : index
      %c0_62 = arith.constant 0 : index
      %c0_63 = arith.constant 0 : index
      %164 = vector.load %arg11[%c0_61, %c0_62, %c0_63] : memref<2x8x32xf32, #tpu.memory_space<vmem>>, vector<2x8x32xf32>
      tpu.vector_store %arg11[%c0_61, %c0_62, %c0_63], %163 {strides = array<i32>} : memref<2x8x32xf32, #tpu.memory_space<vmem>>, vector<2x8x32xf32>,
    } else {
    }
    %c0 = arith.constant 0 : index
    %c0_1 = arith.constant 0 : index
    %c0_2 = arith.constant 0 : index
    %3 = vector.load %arg11[%c0, %c0_1, %c0_2] : memref<2x8x32xf32, #tpu.memory_space<vmem>>, vector<2x8x32xf32>
    %4 = vector.shape_cast %3 : vector<2x8x32xf32> to vector<16x32xf32>
    %c0_3 = arith.constant 0 : index
    %c0_4 = arith.constant 0 : index
    %c0_5 = arith.constant 0 : index
    %5 = vector.load %arg3[%c0_3, %c0_4, %c0_5] : memref<1x9x32xf32, #tpu.memory_space<vmem>>, vector<1x9x32xf32>
    %6 = vector.shape_cast %5 : vector<1x9x32xf32> to vector<9x32xf32>
    %7 = vector.extract_strided_slice %6 {offsets = [0, 0], sizes = [1, 32], strides = [1, 1]} : vector<9x32xf32> to vector<1x32xf32>
    %8 = vector.extract_strided_slice %6 {offsets = [1, 0], sizes = [1, 32], strides = [1, 1]} : vector<9x32xf32> to vector<1x32xf32>
    %9 = vector.extract_strided_slice %6 {offsets = [2, 0], sizes = [1, 32], strides = [1, 1]} : vector<9x32xf32> to vector<1x32xf32>
    %10 = vector.extract_strided_slice %6 {offsets = [3, 0], sizes = [1, 32], strides = [1, 1]} : vector<9x32xf32> to vector<1x32xf32>
    %11 = vector.extract_strided_slice %6 {offsets = [4, 0], sizes = [1, 32], strides = [1, 1]} : vector<9x32xf32> to vector<1x32xf32>
    %12 = vector.extract_strided_slice %6 {offsets = [5, 0], sizes = [1, 32], strides = [1, 1]} : vector<9x32xf32> to vector<1x32xf32>
    %13 = vector.extract_strided_slice %6 {offsets = [6, 0], sizes = [1, 32], strides = [1, 1]} : vector<9x32xf32> to vector<1x32xf32>
    %14 = vector.extract_strided_slice %6 {offsets = [7, 0], sizes = [1, 32], strides = [1, 1]} : vector<9x32xf32> to vector<1x32xf32>
    %15 = vector.extract_strided_slice %6 {offsets = [8, 0], sizes = [1, 32], strides = [1, 1]} : vector<9x32xf32> to vector<1x32xf32>
    %c0_6 = arith.constant 0 : index
    %c0_7 = arith.constant 0 : index
    %c0_8 = arith.constant 0 : index
    %16 = vector.load %arg4[%c0_6, %c0_7, %c0_8] : memref<1x1x128xf32, #tpu.memory_space<vmem>>, vector<1x1x128xf32>
    %17 = vector.shape_cast %16 : vector<1x1x128xf32> to vector<1x128xf32>
    %cst = arith.constant dense<0.000000e+00> : vector<16xf32>
    %18 = vector.multi_reduction <add>, %4, %cst [1] : vector<16x32xf32> to vector<16xf32>
    %19 = vector.shape_cast %18 : vector<16xf32> to vector<16x1xf32>
    %cst_9 = arith.constant 3.200000e+01 : f32
    %20 = vector.broadcast %cst_9 : f32 to vector<16x1xf32>
    %21 = arith.divf %19, %20 : vector<16x1xf32>
    %22 = vector.broadcast %21 : vector<16x1xf32> to vector<16x32xf32>
    %23 = arith.subf %4, %22 : vector<16x32xf32>
    %24 = arith.mulf %23, %23 : vector<16x32xf32>
    %cst_10 = arith.constant dense<0.000000e+00> : vector<16xf32>
    %25 = vector.multi_reduction <add>, %24, %cst_10 [1] : vector<16x32xf32> to vector<16xf32>
    %26 = vector.shape_cast %25 : vector<16xf32> to vector<16x1xf32>
    %cst_11 = arith.constant 3.200000e+01 : f32
    %27 = vector.broadcast %cst_11 : f32 to vector<16x1xf32>
    %28 = arith.divf %26, %27 : vector<16x1xf32>
    %29 = vector.broadcast %21 : vector<16x1xf32> to vector<16x32xf32>
    %30 = arith.subf %4, %29 : vector<16x32xf32>
    %cst_12 = arith.constant 9.99999974E-6 : f32
    %31 = vector.broadcast %cst_12 : f32 to vector<16x1xf32>
    %32 = arith.addf %28, %31 : vector<16x1xf32>
    %33 = math.rsqrt %32 : vector<16x1xf32>
    %34 = vector.broadcast %33 : vector<16x1xf32> to vector<16x32xf32>
    %35 = arith.mulf %30, %34 : vector<16x32xf32>
    %36 = vector.broadcast %7 : vector<1x32xf32> to vector<16x32xf32>
    %37 = arith.mulf %35, %36 : vector<16x32xf32>
    %38 = vector.broadcast %8 : vector<1x32xf32> to vector<16x32xf32>
    %39 = arith.addf %37, %38 : vector<16x32xf32>
    %40 = arith.truncf %39 : vector<16x32xf32> to vector<16x32xbf16>
    %c0_13 = arith.constant 0 : index
    %c0_14 = arith.constant 0 : index
    %c0_15 = arith.constant 0 : index
    %41 = vector.load %arg5[%c0_13, %c0_14, %c0_15] : memref<1x32x32xbf16, #tpu.memory_space<vmem>>, vector<1x32x32xbf16>
    %42 = vector.shape_cast %41 : vector<1x32x32xbf16> to vector<32x32xbf16>
    %cst_16 = arith.constant dense<0.000000e+00> : vector<16x32xf32>
    %43 = tpu.matmul %40, %42, %cst_16 {dimension_numbers = #tpu.dot_dimension_numbers<[1], [0], [0], [1], [0, 0, 1, 1], [], []>} : vector<16x32xbf16>, vector<32x32xbf16>, vector<16x32xf32> -> vector<16x32xf32>
    %44 = vector.broadcast %9 : vector<1x32xf32> to vector<16x32xf32>
    %45 = arith.addf %43, %44 : vector<16x32xf32>
    %cst_17 = arith.constant 0.353553385 : f32
    %46 = vector.broadcast %cst_17 : f32 to vector<16x32xf32>
    %47 = arith.mulf %45, %46 : vector<16x32xf32>
    %c0_18 = arith.constant 0 : index
    %c0_19 = arith.constant 0 : index
    %c0_20 = arith.constant 0 : index
    %48 = vector.load %arg6[%c0_18, %c0_19, %c0_20] : memref<1x32x32xbf16, #tpu.memory_space<vmem>>, vector<1x32x32xbf16>
    %49 = vector.shape_cast %48 : vector<1x32x32xbf16> to vector<32x32xbf16>
    %cst_21 = arith.constant dense<0.000000e+00> : vector<16x32xf32>
    %50 = tpu.matmul %40, %49, %cst_21 {dimension_numbers = #tpu.dot_dimension_numbers<[1], [0], [0], [1], [0, 0, 1, 1], [], []>} : vector<16x32xbf16>, vector<32x32xbf16>, vector<16x32xf32> -> vector<16x32xf32>
    %51 = vector.broadcast %10 : vector<1x32xf32> to vector<16x32xf32>
    %52 = arith.addf %50, %51 : vector<16x32xf32>
    %c0_22 = arith.constant 0 : index
    %c0_23 = arith.constant 0 : index
    %c0_24 = arith.constant 0 : index
    %53 = vector.load %arg7[%c0_22, %c0_23, %c0_24] : memref<1x32x32xbf16, #tpu.memory_space<vmem>>, vector<1x32x32xbf16>
    %54 = vector.shape_cast %53 : vector<1x32x32xbf16> to vector<32x32xbf16>
    %cst_25 = arith.constant dense<0.000000e+00> : vector<16x32xf32>
    %55 = tpu.matmul %40, %54, %cst_25 {dimension_numbers = #tpu.dot_dimension_numbers<[1], [0], [0], [1], [0, 0, 1, 1], [], []>} : vector<16x32xbf16>, vector<32x32xbf16>, vector<16x32xf32> -> vector<16x32xf32>
    %56 = vector.broadcast %11 : vector<1x32xf32> to vector<16x32xf32>
    %57 = arith.addf %55, %56 : vector<16x32xf32>
    %58 = arith.truncf %47 : vector<16x32xf32> to vector<16x32xbf16>
    %59 = vector.shape_cast %58 : vector<16x32xbf16> to vector<2x8x4x8xbf16>
    %60 = tpu.transpose %59, [0, 2, 1, 3] : vector<2x8x4x8xbf16> -> vector<2x4x8x8xbf16>
    %61 = vector.shape_cast %60 : vector<2x4x8x8xbf16> to vector<8x8x8xbf16>
    %62 = arith.truncf %52 : vector<16x32xf32> to vector<16x32xbf16>
    %63 = vector.shape_cast %62 : vector<16x32xbf16> to vector<2x8x4x8xbf16>
    %64 = tpu.transpose %63, [0, 2, 1, 3] : vector<2x8x4x8xbf16> -> vector<2x4x8x8xbf16>
    %65 = vector.shape_cast %64 : vector<2x4x8x8xbf16> to vector<8x8x8xbf16>
    %66 = arith.truncf %57 : vector<16x32xf32> to vector<16x32xbf16>
    %67 = vector.shape_cast %66 : vector<16x32xbf16> to vector<2x8x4x8xbf16>
    %68 = tpu.transpose %67, [0, 2, 1, 3] : vector<2x8x4x8xbf16> -> vector<2x4x8x8xbf16>
    %69 = vector.shape_cast %68 : vector<2x4x8x8xbf16> to vector<8x8x8xbf16>
    %cst_26 = arith.constant 0xFF800000 : f32
    %70 = vector.broadcast %cst_26 : f32 to vector<8x8x1xf32>
    %cst_27 = arith.constant 0.000000e+00 : f32
    %71 = vector.broadcast %cst_27 : f32 to vector<8x8x1xf32>
    %cst_28 = arith.constant 0.000000e+00 : f32
    %72 = vector.broadcast %cst_28 : f32 to vector<8x8x8xf32>
    "tpu.trace_start"() <{level = 10 : i32, message = "bqd,bkd->bqk"}> : () -> ()
    %cst_29 = arith.constant dense<0.000000e+00> : vector<8x8x8xf32>
    %73 = tpu.matmul %61, %65, %cst_29 {dimension_numbers = #tpu.dot_dimension_numbers<[2], [2], [1], [1], [0, 0, 0, 1, 1, 1], [0], [0]>} : vector<8x8x8xbf16>, vector<8x8x8xbf16>, vector<8x8x8xf32> -> vector<8x8x8xf32>
    "tpu.trace_stop"() : () -> ()
    %74 = tpu.iota {dimensions = array<i32: 0>} : vector<8x8xi32>
    %75 = tpu.iota {dimensions = array<i32: 1>} : vector<8x8xi32>
    %76 = arith.cmpi sle, %75, %74 : vector<8x8xi32>
    %77 = vector.shape_cast %76 : vector<8x8xi1> to vector<1x8x8xi1>
    %cst_30 = arith.constant -1.000000e+30 : f32
    %78 = vector.shape_cast %77 : vector<1x8x8xi1> to vector<1x8x8xi1>
    %79 = vector.broadcast %78 : vector<1x8x8xi1> to vector<8x8x8xi1>
    %80 = vector.broadcast %cst_30 : f32 to vector<8x8x8xf32>
    %81 = arith.select %79, %73, %80 : vector<8x8x8xi1>, vector<8x8x8xf32>
    %cst_31 = arith.constant dense<0xFF800000> : vector<8x8xf32>
    %82 = vector.multi_reduction <maximumf>, %81, %cst_31 [2] : vector<8x8x8xf32> to vector<8x8xf32>
    %83 = vector.shape_cast %82 : vector<8x8xf32> to vector<8x8x1xf32>
    %84 = arith.maximumf %70, %83 : vector<8x8x1xf32>
    %85 = arith.subf %70, %84 : vector<8x8x1xf32>
    %86 = math.exp %85 : vector<8x8x1xf32>
    %87 = vector.broadcast %84 : vector<8x8x1xf32> to vector<8x8x8xf32>
    %88 = arith.subf %81, %87 : vector<8x8x8xf32>
    %89 = math.exp %88 : vector<8x8x8xf32>
    %90 = arith.mulf %86, %71 : vector<8x8x1xf32>
    %cst_32 = arith.constant dense<0.000000e+00> : vector<8x8xf32>
    %91 = vector.multi_reduction <add>, %89, %cst_32 [2] : vector<8x8x8xf32> to vector<8x8xf32>
    %92 = vector.shape_cast %91 : vector<8x8xf32> to vector<8x8x1xf32>
    %93 = arith.addf %90, %92 : vector<8x8x1xf32>
    %94 = vector.broadcast %86 : vector<8x8x1xf32> to vector<8x8x8xf32>
    %95 = arith.mulf %94, %72 : vector<8x8x8xf32>
    %96 = arith.truncf %89 : vector<8x8x8xf32> to vector<8x8x8xbf16>
    "tpu.trace_start"() <{level = 10 : i32, message = "bqk,bkd->bqd"}> : () -> ()
    %cst_33 = arith.constant dense<0.000000e+00> : vector<8x8x8xf32>
    %97 = tpu.matmul %96, %69, %cst_33 {dimension_numbers = #tpu.dot_dimension_numbers<[2], [1], [1], [2], [0, 0, 0, 1, 1, 2], [0], [0]>} : vector<8x8x8xbf16>, vector<8x8x8xbf16>, vector<8x8x8xf32> -> vector<8x8x8xf32>
    "tpu.trace_stop"() : () -> ()
    %98 = arith.addf %95, %97 : vector<8x8x8xf32>
    %99 = tpu.reciprocal %93 {approx = true} : vector<8x8x1xf32> -> vector<8x8x1xf32>
    %100 = vector.broadcast %99 : vector<8x8x1xf32> to vector<8x8x8xf32>
    %101 = arith.mulf %98, %100 : vector<8x8x8xf32>
    %102 = arith.truncf %101 : vector<8x8x8xf32> to vector<8x8x8xbf16>
    %103 = vector.shape_cast %102 : vector<8x8x8xbf16> to vector<2x4x8x8xbf16>
    %104 = tpu.transpose %103, [0, 2, 1, 3] : vector<2x4x8x8xbf16> -> vector<2x8x4x8xbf16>
    %105 = vector.shape_cast %104 : vector<2x8x4x8xbf16> to vector<16x32xbf16>
    %c0_34 = arith.constant 0 : index
    %c0_35 = arith.constant 0 : index
    %c0_36 = arith.constant 0 : index
    %106 = vector.load %arg8[%c0_34, %c0_35, %c0_36] : memref<1x32x32xbf16, #tpu.memory_space<vmem>>, vector<1x32x32xbf16>
    %107 = vector.shape_cast %106 : vector<1x32x32xbf16> to vector<32x32xbf16>
    %cst_37 = arith.constant dense<0.000000e+00> : vector<16x32xf32>
    %108 = tpu.matmul %105, %107, %cst_37 {dimension_numbers = #tpu.dot_dimension_numbers<[1], [0], [0], [1], [0, 0, 1, 1], [], []>} : vector<16x32xbf16>, vector<32x32xbf16>, vector<16x32xf32> -> vector<16x32xf32>
    %109 = vector.broadcast %12 : vector<1x32xf32> to vector<16x32xf32>
    %110 = arith.addf %108, %109 : vector<16x32xf32>
    %111 = arith.addf %4, %110 : vector<16x32xf32>
    %cst_38 = arith.constant dense<0.000000e+00> : vector<16xf32>
    %112 = vector.multi_reduction <add>, %111, %cst_38 [1] : vector<16x32xf32> to vector<16xf32>
    %113 = vector.shape_cast %112 : vector<16xf32> to vector<16x1xf32>
    %cst_39 = arith.constant 3.200000e+01 : f32
    %114 = vector.broadcast %cst_39 : f32 to vector<16x1xf32>
    %115 = arith.divf %113, %114 : vector<16x1xf32>
    %116 = vector.broadcast %115 : vector<16x1xf32> to vector<16x32xf32>
    %117 = arith.subf %111, %116 : vector<16x32xf32>
    %118 = arith.mulf %117, %117 : vector<16x32xf32>
    %cst_40 = arith.constant dense<0.000000e+00> : vector<16xf32>
    %119 = vector.multi_reduction <add>, %118, %cst_40 [1] : vector<16x32xf32> to vector<16xf32>
    %120 = vector.shape_cast %119 : vector<16xf32> to vector<16x1xf32>
    %cst_41 = arith.constant 3.200000e+01 : f32
    %121 = vector.broadcast %cst_41 : f32 to vector<16x1xf32>
    %122 = arith.divf %120, %121 : vector<16x1xf32>
    %123 = vector.broadcast %115 : vector<16x1xf32> to vector<16x32xf32>
    %124 = arith.subf %111, %123 : vector<16x32xf32>
    %cst_42 = arith.constant 9.99999974E-6 : f32
    %125 = vector.broadcast %cst_42 : f32 to vector<16x1xf32>
    %126 = arith.addf %122, %125 : vector<16x1xf32>
    %127 = math.rsqrt %126 : vector<16x1xf32>
    %128 = vector.broadcast %127 : vector<16x1xf32> to vector<16x32xf32>
    %129 = arith.mulf %124, %128 : vector<16x32xf32>
    %130 = vector.broadcast %13 : vector<1x32xf32> to vector<16x32xf32>
    %131 = arith.mulf %129, %130 : vector<16x32xf32>
    %132 = vector.broadcast %14 : vector<1x32xf32> to vector<16x32xf32>
    %133 = arith.addf %131, %132 : vector<16x32xf32>
    %134 = arith.truncf %133 : vector<16x32xf32> to vector<16x32xbf16>
    %c0_43 = arith.constant 0 : index
    %c0_44 = arith.constant 0 : index
    %c0_45 = arith.constant 0 : index
    %135 = vector.load %arg9[%c0_43, %c0_44, %c0_45] : memref<1x32x128xbf16, #tpu.memory_space<vmem>>, vector<1x32x128xbf16>
    %136 = vector.shape_cast %135 : vector<1x32x128xbf16> to vector<32x128xbf16>
    %cst_46 = arith.constant dense<0.000000e+00> : vector<16x128xf32>
    %137 = tpu.matmul %134, %136, %cst_46 {dimension_numbers = #tpu.dot_dimension_numbers<[1], [0], [0], [1], [0, 0, 1, 1], [], []>} : vector<16x32xbf16>, vector<32x128xbf16>, vector<16x128xf32> -> vector<16x128xf32>
    %138 = vector.broadcast %17 : vector<1x128xf32> to vector<16x128xf32>
    %139 = arith.addf %137, %138 : vector<16x128xf32>
    %140 = arith.mulf %139, %139 : vector<16x128xf32>
    %141 = arith.mulf %139, %140 : vector<16x128xf32>
    %cst_47 = arith.constant 4.471500e-02 : f32
    %142 = vector.broadcast %cst_47 : f32 to vector<16x128xf32>
    %143 = arith.mulf %142, %141 : vector<16x128xf32>
    %144 = arith.addf %139, %143 : vector<16x128xf32>
    %cst_48 = arith.constant 0.797884583 : f32
    %145 = vector.broadcast %cst_48 : f32 to vector<16x128xf32>
    %146 = arith.mulf %145, %144 : vector<16x128xf32>
    %147 = math.tanh %146 : vector<16x128xf32>
    %cst_49 = arith.constant 1.000000e+00 : f32
    %148 = vector.broadcast %cst_49 : f32 to vector<16x128xf32>
    %149 = arith.addf %148, %147 : vector<16x128xf32>
    %cst_50 = arith.constant 5.000000e-01 : f32
    %150 = vector.broadcast %cst_50 : f32 to vector<16x128xf32>
    %151 = arith.mulf %150, %149 : vector<16x128xf32>
    %152 = arith.mulf %139, %151 : vector<16x128xf32>
    %153 = arith.truncf %152 : vector<16x128xf32> to vector<16x128xbf16>
    %c0_51 = arith.constant 0 : index
    %c0_52 = arith.constant 0 : index
    %c0_53 = arith.constant 0 : index
    %154 = vector.load %arg10[%c0_51, %c0_52, %c0_53] : memref<1x128x32xbf16, #tpu.memory_space<vmem>>, vector<1x128x32xbf16>
    %155 = vector.shape_cast %154 : vector<1x128x32xbf16> to vector<128x32xbf16>
    %cst_54 = arith.constant dense<0.000000e+00> : vector<16x32xf32>
    %156 = tpu.matmul %153, %155, %cst_54 {dimension_numbers = #tpu.dot_dimension_numbers<[1], [0], [0], [1], [0, 0, 1, 1], [], []>} : vector<16x128xbf16>, vector<128x32xbf16>, vector<16x32xf32> -> vector<16x32xf32>
    %157 = vector.broadcast %15 : vector<1x32xf32> to vector<16x32xf32>
    %158 = arith.addf %156, %157 : vector<16x32xf32>
    %159 = arith.addf %111, %158 : vector<16x32xf32>
    %160 = vector.shape_cast %159 : vector<16x32xf32> to vector<2x8x32xf32>
    %c0_55 = arith.constant 0 : index
    %c0_56 = arith.constant 0 : index
    %c0_57 = arith.constant 0 : index
    %161 = vector.load %arg11[%c0_55, %c0_56, %c0_57] : memref<2x8x32xf32, #tpu.memory_space<vmem>>, vector<2x8x32xf32>
    tpu.vector_store %arg11[%c0_55, %c0_56, %c0_57], %160 {strides = array<i32>} : memref<2x8x32xf32, #tpu.memory_space<vmem>>, vector<2x8x32xf32>,
    return
  }
  func.func @transform_0(%arg0: i32, %arg1: i32) -> (i32, i32, i32) {
    %c0_i32 = arith.constant 0 : i32
    %c0_i32_0 = arith.constant 0 : i32
    %c0_i32_1 = arith.constant 0 : i32
    return %arg0, %c0_i32, %c0_i32_0 : i32, i32, i32
  }
  func.func @transform_1(%arg0: i32, %arg1: i32) -> (i32, i32, i32) {
    %c0_i32 = arith.constant 0 : i32
    %c0_i32_0 = arith.constant 0 : i32
    %c0_i32_1 = arith.constant 0 : i32
    return %arg1, %c0_i32, %c0_i32_0 : i32, i32, i32
  }
  func.func @transform_2(%arg0: i32, %arg1: i32) -> (i32, i32, i32) {
    %c0_i32 = arith.constant 0 : i32
    %c0_i32_0 = arith.constant 0 : i32
    %c0_i32_1 = arith.constant 0 : i32
    return %arg1, %c0_i32, %c0_i32_0 : i32, i32, i32
  }
  func.func @transform_3(%arg0: i32, %arg1: i32) -> (i32, i32, i32) {
    %c0_i32 = arith.constant 0 : i32
    %c0_i32_0 = arith.constant 0 : i32
    %c0_i32_1 = arith.constant 0 : i32
    return %arg1, %c0_i32, %c0_i32_0 : i32, i32, i32
  }
  func.func @transform_4(%arg0: i32, %arg1: i32) -> (i32, i32, i32) {
    %c0_i32 = arith.constant 0 : i32
    %c0_i32_0 = arith.constant 0 : i32
    %c0_i32_1 = arith.constant 0 : i32
    return %arg1, %c0_i32, %c0_i32_0 : i32, i32, i32
  }
  func.func @transform_5(%arg0: i32, %arg1: i32) -> (i32, i32, i32) {
    %c0_i32 = arith.constant 0 : i32
    %c0_i32_0 = arith.constant 0 : i32
    %c0_i32_1 = arith.constant 0 : i32
    return %arg1, %c0_i32, %c0_i32_0 : i32, i32, i32
  }
  func.func @transform_6(%arg0: i32, %arg1: i32) -> (i32, i32, i32) {
    %c0_i32 = arith.constant 0 : i32
    %c0_i32_0 = arith.constant 0 : i32
    %c0_i32_1 = arith.constant 0 : i32
    return %arg1, %c0_i32, %c0_i32_0 : i32, i32, i32
  }
  func.func @transform_7(%arg0: i32, %arg1: i32) -> (i32, i32, i32) {
    %c0_i32 = arith.constant 0 : i32
    %c0_i32_0 = arith.constant 0 : i32
    %c0_i32_1 = arith.constant 0 : i32
    return %arg1, %c0_i32, %c0_i32_0 : i32, i32, i32
  }
  func.func @transform_8(%arg0: i32, %arg1: i32) -> (i32, i32, i32) {
    %c0_i32 = arith.constant 0 : i32
    %c0_i32_0 = arith.constant 0 : i32
    %c0_i32_1 = arith.constant 0 : i32
    return %arg1, %c0_i32, %c0_i32_0 : i32, i32, i32
  }
  func.func @transform_9(%arg0: i32, %arg1: i32) -> (i32, i32, i32) {
    %c0_i32 = arith.constant 0 : i32
    %c0_i32_0 = arith.constant 0 : i32
    %c0_i32_1 = arith.constant 0 : i32
    return %arg0, %c0_i32, %c0_i32_0 : i32, i32, i32
  }
}

</mosaic_0001>

<bundles_post_ra>
// kernel: decoder_forward.1
= control target key start
LH: loop header
LB: loop body
LE: loop exit
PB: predicated region body
PF: predicated region fallthrough
CT: control target
= control target key end

     0   :  { %s4370_s0 = inlined_call_operand.vmem [shape: bf16[2,8,32], index: 0, kind: input, shape index: {}]   ;;  %s4371_s1 = inlined_call_operand.vmem [shape: f32[2,9,32], index: 1, kind: input, shape index: {}]   ;;  %s4372_s2 = inlined_call_operand.vmem [shape: f32[2,1,128], index: 2, kind: input, shape index: {}]   ;;  %s4373_s3 = inlined_call_operand.vmem [shape: bf16[2,32,32], index: 3, kind: input, shape index: {}]   ;;  %s4374_s4 = inlined_call_operand.vmem [shape: bf16[2,32,32], index: 4, kind: input, shape index: {}]   ;;  %s4375_s5 = inlined_call_operand.vmem [shape: bf16[2,32,32], index: 5, kind: input, shape index: {}]   ;;  %s4376_s6 = inlined_call_operand.vmem [shape: bf16[2,32,32], index: 6, kind: input, shape index: {}]   ;;  %s4377_s7 = inlined_call_operand.vmem [shape: bf16[2,32,128], index: 7, kind: input, shape index: {}]   ;;  %s4378_s8 = inlined_call_operand.vmem [shape: bf16[2,128,32], index: 8, kind: input, shape index: {}]   ;;  %s4379_s9 = inlined_call_operand.hbm [shape: f32[2,8,32], index: 9, kind: output, shape index: {}]  }
   0x1   :  { %4380 = sst [smem:[#allocation5_spill]] %s4371_s1 }
   0x2   :  { %14 = vsyncpa [#allocation3], 0  ;;  %s3808_s30 = smov 0   ;;  %s3810_s10 = smov 0  }
   0x3   :  { %s3812_s11 = smov 0  }
   0x4 LB: > { %s29_s13 = sadd.s32 1, %s3739_s10  ;;  %p3273_p1 = scmp.ge.s32.totalorder %s3743_s11, 1  ;;  %s3743_s11 = sphi %s3812_s11, %s20_s11   ;;  %s3739_s10 = sphi %s3810_s10, %s4388_s10   ;;  %s3735_s30 = sphi %s3808_s30, %s4387_s30  }
   0x5   : > { %p30_p0 = scmp.ge.s32.totalorder %s29_s13, 2  ;;  %p379_p2 = scmp.lt.s32.totalorder %s3743_s11, 3 }
   0x7   : > { %s4390_s13 = smov (%p30_p0, %s29_s13), 0  ;;  %p380_p3 = pnand %p3273_p1, %p379_p2 }
   0x8   : > { %p454_p4 = scmp.lt.s32.totalorder (!%p380_p3), %s3735_s30, 1  ;;  %s4381_s1 = sld [smem:[#allocation5_spill]] (!%p380_p3) }
   0x9   : > { %383 = sbr.rel (%p380_p3) target bundleno = 2431 (0x97f), region = 56  ;;  %p3288_p5 = scmp.ne.s32.totalorder (!%p380_p3), %s3735_s30, 0 }
   0xe   : > { %s3827_s14 = scalar_select %p454_p4, %s3735_s30, 1 }
  0x10   : > { %s3346_s15 = sshll.u32 %s3827_s14, 4  ;;  %s3352_s23 = sshll.u32 %s3827_s14, 6 }
  0x11   : > { %s3837_s21 = scalar_lea.vmem %s4381_s1, %s3346_s15  ;;  %s3842_s24 = scalar_lea.vmem %s4373_s3, %s3346_s15 }
  0x12   : > { %s3847_s27 = scalar_lea.vmem %s4374_s4, %s3346_s15  ;;  %s3852_s16 = scalar_lea.vmem %s4375_s5, %s3346_s15 }
  0x13   : > { %s3857_s19 = scalar_lea.vmem %s4376_s6, %s3346_s15  ;;  %s3862_s22 = scalar_lea.vmem %s4377_s7, %s3346_s15 }
  0x14   : > { %s3868_s26 = scalar_lea.vmem %s4378_s8, %s3352_s23  ;;  %497 = sbr.rel (%p3288_p5) target bundleno = 29 (0x1d), region = 60 }
  0x19   : > { %v3354_v0 = vld [vmem:[%s4370_s0] sm:$0xff]   ;;  %vm502_vm0 = vcmask 261120  }
  0x1a   : > { %v3355_v1 = vunpack.c.l.bf16 %v3354_v0  ;;  %v3356_v2 = vunpack.c.h.bf16 %v3354_v0 }
  0x1c   : > { %503 = vst.msk [vmem:[#allocation2] sm:$0xff] %vm502_vm0, %v3355_v1  ;;  %504 = vst.msk [vmem:[#allocation2 + $0x8] sm:$0xff] %vm502_vm0, %v3356_v2 }
  0x1d PF: > { %vm510_vm1 = vcmask 261120   ;;  %v3612_v17 = vld [vmem:[%s3842_s24 + $0x8] sm:$0xff]   ;;  %v3745_v18 = vmov 0.0   ;;  %vm3746_vm2 = vmmov 0   ;;  %v3613_v19 = vld [vmem:[%s3842_s24] sm:$0xff]   ;;  %v538_v26 = vlaneseq  ;;  %s3747_s1 = smov 112   ;;  %s4384_s17 = scalar_lea.vmem %s4372_s2, %s3827_s14 }
  0x1e   : > { %3413 = vmatprep.subr.bf16.mxu0 %v3745_v18  ;;  %3417 = vmatprep.mubr.msk.bf16.mxu0 %vm3746_vm2, %v3745_v18  ;;  %v507_v29 = vld [vmem:[%s3837_s21] sm:$0xff]  ;;  %v3614_v41 = vld [vmem:[%s3847_s27 + $0x8] sm:$0xff]   ;;  %s3748_s30 = smov 120   ;;  %s3749_s12 = smov 104   ;;  %vm1585_vm3 = vcmask 64512   ;;  %vm2092_vm5 = vcmask 1043456  }
  0x1f   : > { %3414 = vmatpush3.bf16.msra.mxu0 %v3612_v17  ;;  %3437 = vmatprep.subr.bf16.mxu1 %v3745_v18  ;;  %v3888_v27 = vshrl.u32 %v538_v26, 7  ;;  %v3615_v43 = vld [vmem:[%s3847_s27] sm:$0xff]   ;;  %v3616_v44 = vld [vmem:[%s3852_s16 + $0x8] sm:$0xff]   ;;  %s3753_s15 = smov 16   ;;  %s3754_s18 = smov 8   ;;  %vm2803_vm6 = vcmask 130048  }
  0x20   : > { %3415 = vmatprep.subr.bf16.mxu0 %v3745_v18  ;;  %3439 = vmatprep.mubr.msk.bf16.mxu1 %vm3746_vm2, %v3745_v18  ;;  %v3617_v45 = vld [vmem:[%s3852_s16] sm:$0xff]   ;;  %s3755_s24 = smov 24   ;;  %vm2806_vm7 = vcmask 195584   ;;  %s3756_s14 = smov [#allocation2]  }
  0x21   : > { %v540_v28 = vsub.s32 0, %v3888_v27  ;;  %v546_v33 = vsub.s32 1, %v3888_v27  ;;  %v557_v49 = vsub.s32 2, %v3888_v27  ;;  %v623_v50 = vsub.s32 3, %v3888_v27  ;;  %s4385_s20 = sadd.s32 4294967295, %s3743_s11  }
  0x22   : > { %v684_v61 = vsub.s32 4, %v3888_v27  ;;  %p4343_p6 = scmp.eq.s32.totalorder %s4385_s20, 1 }
  0x23   : > { %v505_v3 = vld [vmem:[#allocation2] sm:$0xff]  ;;  %v506_v4 = vld [vmem:[#allocation2 + $0x8] sm:$0xff]  ;;  %3416 = vmatpush3.bf16.msra.mxu0 %v3613_v19  ;;  %v541_v32 = vrot.slane %v507_v29, %v540_v28  ;;  %v547_v37 = vrot.slane %v507_v29, %v546_v33  ;;  %v558_v53 = vrot.slane %v507_v29, %v557_v49  ;;  %v624_v54 = vrot.slane %v507_v29, %v623_v50 }
  0x24   : > { %v511_v5 = vsel %vm510_vm1, %v505_v3, 0.0  ;;  %v514_v6 = vsel %vm510_vm1, %v506_v4, 0.0  ;;  %3421 = vmatprep.subr.bf16.mxu0 %v3745_v18  ;;  %v3752_v19 = vmov 0  }
  0x25   : > { %512 = vadd.xlane.f32.xlu0 %v511_v5 }
  0x29   : > { %515 = vadd.xlane.f32.xlu0 %v514_v6 }
  0xae   : > { %v513_v7 = vpop.xlane.xlu0 %512 }
  0xaf   : > { %v518_v8 = vmul.f32 0.03125, %v513_v7 }
  0xb1   : > { %v520_v9 = vsub.f32 %v505_v3, %v518_v8  ;;  %v685_v3 = vrot.slane %v507_v29, %v684_v61 }
  0xb2   : > { %v516_v10 = vpop.xlane.xlu0 %515 }
  0xb3   : > { %v519_v11 = vmul.f32 0.03125, %v516_v10  ;;  %v522_v12 = vmul.f32 %v520_v9, %v520_v9 }
  0xb5   : > { %v521_v13 = vsub.f32 %v506_v4, %v519_v11  ;;  %v524_v14 = vsel %vm510_vm1, %v522_v12, 0.0  ;;  %v3750_v11 = vmov 1983009808  }
  0xb6   : > { %525 = vadd.xlane.f32.xlu1 %v524_v14  ;;  %v771_v12 = vunpack.c.l.s4 %v3750_v11 }
  0xb7   : > { %v523_v15 = vmul.f32 %v521_v13, %v521_v13 }
  0xb9   : > { %v527_v16 = vsel %vm510_vm1, %v523_v15, 0.0 }
  0xba   : > { %528 = vadd.xlane.f32.xlu1 %v527_v16  ;;  %v3751_v16 = vmov 1934713408  }
  0xbb   : > { %v802_v17 = vunpack.c.l.s4 %v3751_v16 }
  0xbd   : > { %v803_v28 = vunpack.c.0.s8 %v802_v17 }
 0x13f   : > { %v526_v20 = vpop.xlane.xlu1 %525 }
 0x140   : > { %v530_v21 = vmul.f32 0.03125, %v526_v20  ;;  %v3927_v20 = vpack.i.b16 %v3752_v19, %v3752_v19 }
 0x142   : > { %v532_v22 = vadd.f32 1e-05, %v530_v21 }
 0x143   : > { %v529_v23 = vpop.xlane.xlu1 %528 }
 0x144   : > { %3630 = vrsqrt.f32 %v532_v22  ;;  %v531_v24 = vmul.f32 0.03125, %v529_v23 }
 0x146   : > { %v533_v25 = vadd.f32 1e-05, %v531_v24 }
 0x148   : > { %3632 = vrsqrt.f32 %v533_v25 }
 0x151   : > { %v3631_v30 = vpop.eup %3630 }
 0x152   : > { %v536_v31 = vmul.f32 %v3631_v30, %v520_v9 }
 0x154   : > { %v542_v36 = vmul.f32 %v541_v32, %v536_v31 }
 0x155   : > { %v3633_v34 = vpop.eup %3632 }
 0x156   : > { %v537_v35 = vmul.f32 %v3633_v34, %v521_v13  ;;  %v548_v39 = vadd.f32 %v547_v37, %v542_v36  ;;  %v772_v13 = vunpack.c.0.s8 %v771_v12 }
 0x158   : > { %v543_v38 = vmul.f32 %v541_v32, %v537_v35  ;;  %v3930_v23 = vsub.s32 %v772_v13, %v3888_v27 }
 0x15a   : > { %v549_v40 = vadd.f32 %v547_v37, %v543_v38  ;;  %v3937_v38 = vsub.s32 %v803_v28, %v3888_v27 }
 0x15c   : > { %v550_v42 = vpack.c.bf16 %v549_v40, %v548_v39 }
 0x15e   : > { %3418 = vmatmul.mubr.msk.bf16.vlgmr.msra.gmra.mxu0 %vm510_vm1, %v550_v42 }
 0x15f   : > { %3422 = vmatpush3.bf16.msra.mxu0 %v3614_v41  ;;  %3425 = vmatprep.mubr.msk.bf16.mxu0 %vm3746_vm2, %v3745_v18 }
 0x160   : > { %3423 = vmatprep.subr.bf16.mxu0 %v3745_v18 }
 0x163   : > { %3424 = vmatpush3.bf16.msra.mxu0 %v3615_v43 }
 0x164   : > { %3429 = vmatprep.subr.bf16.mxu0 %v3745_v18 }
 0x166   : > { %3426 = vmatmul.mubr.msk.bf16.vlgmr.msra.gmra.mxu0 %vm510_vm1, %v550_v42 }
 0x167   : > { %3430 = vmatpush3.bf16.msra.mxu0 %v3616_v44  ;;  %3433 = vmatprep.mubr.msk.bf16.mxu0 %vm3746_vm2, %v3745_v18 }
 0x168   : > { %3431 = vmatprep.subr.bf16.mxu0 %v3745_v18 }
 0x16b   : > { %3432 = vmatpush3.bf16.msra.mxu0 %v3617_v45 }
 0x16c   : > { %3443 = vmatprep.subr.bf16.mxu0 %v3745_v18 }
 0x16e   : > { %3434 = vmatmul.mubr.msk.bf16.vlgmr.msra.gmra.mxu0 %vm510_vm1, %v550_v42 }
 0x16f   : > { %3445 = vmatprep.mubr.msk.bf16.mxu0 %vm3746_vm2, %v3745_v18 }
 0x21e   : > { %v608_v46 = vpop.f32.mrf.mxu0 }
 0x21f   : > { %v609_v58 = vadd.f32 %v608_v46, %v558_v53 }
 0x220   : > { %v3419_v47 = vpop.f32.mrf.mxu0 }
 0x221   : > { %v615_v2 = vmul.f32 0.35355338, %v609_v58 }
 0x222   : > { %v611_v48 = vpop.f32.mrf.mxu0 }
 0x223   : > { %v612_v56 = vadd.f32 %v611_v48, %v558_v53 }
 0x224   : > { %v3420_v51 = vpop.f32.mrf.mxu0 }
 0x225   : > { %v616_v63 = vmul.f32 0.35355338, %v612_v56 }
 0x226   : > { %v671_v52 = vpop.f32.mrf.mxu0 }
 0x227   : > { %v672_v59 = vadd.f32 %v671_v52, %v624_v54  ;;  %v3914_v5 = vpack.c.bf16 %v616_v63, %v615_v2 }
 0x228   : > { %v3427_v55 = vpop.f32.mrf.mxu0 }
 0x229   : > { %v751_v61 = vshrl.u32 %v3914_v5, 16 }
 0x22a   : > { %v674_v57 = vpop.f32.mrf.mxu0 }
 0x22b   : > { %v675_v60 = vadd.f32 %v674_v57, %v624_v54 }
 0x22c   : > { %v3428_v62 = vpop.f32.mrf.mxu0 }
 0x22d   : > { %v1025_v0 = vpack.c.bf16 %v675_v60, %v672_v59 }
 0x22e   : > { %v732_v1 = vpop.f32.mrf.mxu0 }
 0x22f   : > { %1029 = vrot.lane.b32.xlu1 %v1025_v0, %s3747_s1  ;;  %1027 = vrot.lane.b32.xlu0 %v1025_v0, %s3748_s30  ;;  %v733_v7 = vadd.f32 %v732_v1, %v685_v3  ;;  %v1037_v24 = vshrl.u32 %v1025_v0, 16 }
 0x230   : > { %v3435_v4 = vpop.f32.mrf.mxu0 }
 0x232   : > { %v735_v6 = vpop.f32.mrf.mxu0 }
 0x233   : > { %v736_v8 = vadd.f32 %v735_v6, %v685_v3  ;;  %1031 = vrot.lane.b32.xlu1 %v1025_v0, %s3749_s12  ;;  %743 = vrot.lane.b32.xlu0 %v3914_v5, %s3747_s1 }
 0x234   : > { %v3436_v9 = vpop.f32.mrf.mxu0 }
 0x235   : > { %v3919_v10 = vpack.c.bf16 %v736_v8, %v733_v7 }
 0x237   : > { %741 = vrot.lane.b32.xlu1 %v3914_v5, %s3748_s30  ;;  %1307 = vrot.lane.b32.xlu0 %v3919_v10, %s3748_s30 }
 0x23b   : > { %745 = vrot.lane.b32.xlu1 %v3914_v5, %s3749_s12 }
 0x2a1   : > { %v1030_v14 = vpop.permute.xlu1 %1029  ;;  %v1028_v15 = vpop.permute.xlu0 %1027 }
 0x2a2   : > { %v1035_v21 = vpack.i.b16 %v1028_v15, %v1025_v0  ;;  %v1038_v22 = vshrl.u32 %v1028_v15, 16  ;;  %v1045_v30 = vshrl.u32 %v1030_v14, 16 }
 0x2a4   : > { %v1039_v31 = vpack.i.b16 %v1038_v22, %v1037_v24  ;;  %v1049_v32 = vcombine.high %v1035_v21, %v3927_v20  ;;  %v1056_v34 = vrot.slane %v1035_v21, %v3930_v23 }
 0x2a5   : > { %v1032_v25 = vpop.permute.xlu1 %1031  ;;  %v744_v60 = vpop.permute.xlu0 %743 }
 0x2a6   : > { %v1043_v29 = vpack.i.b16 %v1032_v25, %v1030_v14  ;;  %v1046_v33 = vshrl.u32 %v1032_v25, 16  ;;  %v1063_v42 = vrot.slane %v1049_v32, %v3930_v23  ;;  %v1122_v43 = vrot.slane %v1039_v31, %v3930_v23 }
 0x2a7   : > { %v1115_v53 = vcombine.high %v1039_v31, %v3927_v20  ;;  %v759_v7 = vshrl.u32 %v744_v60, 16 }
 0x2a8   : > { %v1064_v35 = vcombine.high %v1043_v29, %v3927_v20  ;;  %v1071_v36 = vrot.slane %v1043_v29, %v3930_v23  ;;  %v1047_v37 = vpack.i.b16 %v1046_v33, %v1045_v30 }
 0x2a9   : > { %v742_v45 = vpop.permute.xlu1 %741  ;;  %v1129_v2 = vrot.slane %v1115_v53, %v3930_v23 }
 0x2aa   : > { %v1078_v39 = vrot.slane %v1064_v35, %v3930_v23  ;;  %v1079_v40 = vcombine.low %v1056_v34, %v1071_v36  ;;  %v1080_v41 = vcombine.high %v1056_v34, %v1071_v36  ;;  %v1137_v44 = vrot.slane %v1047_v37, %v3930_v23 }
 0x2ab   : > { %v1130_v46 = vcombine.high %v1047_v37, %v3927_v20  ;;  %v752_v54 = vshrl.u32 %v742_v45, 16  ;;  %v749_v1 = vpack.i.b16 %v742_v45, %v3914_v5 }
 0x2ac   : > { %v1095_v47 = vcombine.low %v1063_v42, %v1078_v39  ;;  %v1096_v48 = vcombine.high %v1063_v42, %v1078_v39  ;;  %v1145_v49 = vcombine.low %v1122_v43, %v1137_v44  ;;  %v1146_v50 = vcombine.high %v1122_v43, %v1137_v44 }
 0x2ad   : > { %v1087_v51 = vrot.slane %v1079_v40, %v3937_v38  ;;  %v1094_v52 = vrot.slane %v1080_v41, %v3937_v38  ;;  %v1144_v59 = vrot.slane %v1130_v46, %v3930_v23  ;;  %v746_v62 = vpop.permute.xlu1 %745  ;;  %v753_v3 = vpack.i.b16 %v752_v54, %v751_v61 }
 0x2ae   : > { %v1153_v55 = vrot.slane %v1145_v49, %v3937_v38  ;;  %v1160_v56 = vrot.slane %v1146_v50, %v3937_v38  ;;  %v1103_v57 = vrot.slane %v1095_v47, %v3937_v38  ;;  %v1110_v58 = vrot.slane %v1096_v48, %v3937_v38 }
 0x2af   : > { %v1181_v63 = vcombine.low %v1087_v51, %v1094_v52  ;;  %v3302_v0 = vcombine.high %v1087_v51, %v1094_v52  ;;  %v757_v8 = vpack.i.b16 %v746_v62, %v744_v60  ;;  %v1161_v9 = vcombine.low %v1129_v2, %v1144_v59 }
 0x2b0   : > { %v1206_v4 = vcombine.low %v1153_v55, %v1160_v56  ;;  %v3303_v6 = vcombine.high %v1153_v55, %v1160_v56  ;;  %v1162_v11 = vcombine.high %v1129_v2, %v1144_v59  ;;  %v1231_v12 = vcombine.low %v1103_v57, %v1110_v58 }
 0x2b1   : > { %v760_v13 = vshrl.u32 %v746_v62, 16  ;;  %v776_v14 = vrot.slane %v749_v1, %v3930_v23  ;;  %v791_v15 = vrot.slane %v757_v8, %v3930_v23  ;;  %v1188_v16 = vrot.slane %v1181_v63, %v3930_v23 }
 0x2b2   : > { %v1196_v17 = vrot.slane %v3302_v0, %v3930_v23  ;;  %v3304_v5 = vcombine.high %v1103_v57, %v1110_v58  ;;  %v835_v21 = vcombine.high %v753_v3, %v3927_v20  ;;  %v784_v24 = vcombine.high %v757_v8, %v3927_v20 }
 0x2b3   : > { %v761_v22 = vpack.i.b16 %v760_v13, %v759_v7  ;;  %v799_v25 = vcombine.low %v776_v14, %v791_v15  ;;  %v800_v28 = vcombine.high %v776_v14, %v791_v15  ;;  %v1213_v29 = vrot.slane %v1206_v4, %v3930_v23 }
 0x2b4   : > { %v1221_v30 = vrot.slane %v3303_v6, %v3930_v23  ;;  %v769_v31 = vcombine.high %v749_v1, %v3927_v20  ;;  %v842_v32 = vrot.slane %v753_v3, %v3930_v23  ;;  %v3968_v35 = vrot.slane %v1161_v9, %v3937_v38 }
 0x2b5   : > { %v850_v33 = vcombine.high %v761_v22, %v3927_v20  ;;  %v857_v34 = vrot.slane %v761_v22, %v3930_v23  ;;  %v807_v36 = vrot.slane %v799_v25, %v3937_v38  ;;  %v814_v37 = vrot.slane %v800_v28, %v3937_v38 }
 0x2b6   : > { %v1197_v39 = vcombine.low %v1188_v16, %v1196_v17  ;;  %v849_v40 = vrot.slane %v835_v21, %v3930_v23  ;;  %v798_v44 = vrot.slane %v784_v24, %v3930_v23  ;;  %v1222_v47 = vcombine.low %v1213_v29, %v1221_v30 }
 0x2b7   : > { %v864_v41 = vrot.slane %v850_v33, %v3930_v23  ;;  %v865_v42 = vcombine.low %v842_v32, %v857_v34  ;;  %v866_v43 = vcombine.high %v842_v32, %v857_v34  ;;  %v901_v45 = vcombine.low %v807_v36, %v814_v37 }
 0x2b8   : > { %v3298_v46 = vcombine.high %v807_v36, %v814_v37  ;;  %v783_v48 = vrot.slane %v769_v31, %v3930_v23  ;;  %v1204_v55 = vrot.slane %v1197_v39, %v3937_v38  ;;  %v1176_v56 = vrot.slane %v1162_v11, %v3937_v38 }
 0x2b9   : > { %v873_v49 = vrot.slane %v865_v42, %v3937_v38  ;;  %v880_v50 = vrot.slane %v866_v43, %v3937_v38  ;;  %v881_v51 = vcombine.low %v849_v40, %v864_v41  ;;  %v882_v52 = vcombine.high %v849_v40, %v864_v41 }
 0x2ba   : > { %v908_v53 = vrot.slane %v901_v45, %v3930_v23  ;;  %v916_v54 = vrot.slane %v3298_v46, %v3930_v23  ;;  %v1238_v57 = vrot.slane %v1231_v12, %v3930_v23  ;;  %v1246_v60 = vrot.slane %v3304_v5, %v3930_v23 }
 0x2bb   : > { %v926_v58 = vcombine.low %v873_v49, %v880_v50  ;;  %v3299_v59 = vcombine.high %v873_v49, %v880_v50  ;;  %v815_v61 = vcombine.low %v783_v48, %v798_v44  ;;  %v1229_v63 = vrot.slane %v1222_v47, %v3937_v38 }
 0x2bc   : > { %v917_v62 = vcombine.low %v908_v53, %v916_v54  ;;  %v816_v0 = vcombine.high %v783_v48, %v798_v44  ;;  %v889_v1 = vrot.slane %v881_v51, %v3937_v38  ;;  %v896_v4 = vrot.slane %v882_v52, %v3937_v38 }
 0x2bd   : > { %v933_v2 = vrot.slane %v926_v58, %v3930_v23  ;;  %v941_v3 = vrot.slane %v3299_v59, %v3930_v23  ;;  %v1283_v6 = vpack.i.b16 %v1229_v63, %v1204_v55  ;;  %v1284_v7 = vshrl.u32 %v1204_v55, 16 }
 0x2be   : > { %v1285_v8 = vshrl.u32 %v1229_v63, 16  ;;  %v1256_v9 = vcombine.low %v3968_v35, %v1176_v56  ;;  %v3305_v11 = vcombine.high %v3968_v35, %v1176_v56  ;;  %v924_v12 = vrot.slane %v917_v62, %v3937_v38 }
 0x2bf   : > { %v942_v13 = vcombine.low %v933_v2, %v941_v3  ;;  %v1590_v14 = vsel %vm1585_vm3, %v1283_v6, 0  ;;  %v1205_v16 = vcombine.high %v1204_v55, %v3752_v19  ;;  %v1230_v17 = vcombine.high %v1229_v63, %v3752_v19 }
 0x2c0   : > { %v1286_v15 = vpack.i.b16 %v1285_v8, %v1284_v7  ;;  %v823_v5 = vrot.slane %v815_v61, %v3937_v38  ;;  %v830_v21 = vrot.slane %v816_v0, %v3937_v38  ;;  %3438 = vmatpush3.bf16.xpose.msra.mxu1 %v1590_v14  ;;  %v976_v24 = vcombine.low %v889_v1, %v896_v4 }
 0x2c1   : > { %v949_v22 = vrot.slane %v942_v13, %v3937_v38  ;;  %v3301_v25 = vcombine.high %v889_v1, %v896_v4  ;;  %3449 = vmatprep.subr.bf16.mxu1 %v3745_v18  ;;  %v1291_v29 = vshrl.u32 %v1230_v17, 16  ;;  %v1289_v30 = vpack.i.b16 %v1230_v17, %v1205_v16 }
 0x2c2   : > { %v1636_v28 = vsel %vm1585_vm3, %v1286_v15, 0  ;;  %v1004_v31 = vshrl.u32 %v924_v12, 16  ;;  %v1290_v33 = vshrl.u32 %v1205_v16, 16  ;;  %v1247_v35 = vcombine.low %v1238_v57, %v1246_v60 }
 0x2c3   : > { %3444 = vmatpush3.bf16.xpose.msra.mxu0 %v1636_v28  ;;  %v1005_v32 = vshrl.u32 %v949_v22, 16  ;;  %v1003_v34 = vpack.i.b16 %v949_v22, %v924_v12  ;;  %v1263_v36 = vrot.slane %v1256_v9, %v3930_v23  ;;  %v1271_v37 = vrot.slane %v3305_v11, %v3930_v23 }
 0x2c4   : > { %3455 = vmatprep.subr.bf16.mxu0 %v3745_v18  ;;  %v951_v39 = vcombine.low %v823_v5, %v830_v21  ;;  %v3300_v40 = vcombine.high %v823_v5, %v830_v21  ;;  %v1292_v42 = vpack.i.b16 %v1291_v29, %v1290_v33  ;;  %v983_v44 = vrot.slane %v976_v24, %v3930_v23 }
 0x2c5   : > { %v1006_v41 = vpack.i.b16 %v1005_v32, %v1004_v31  ;;  %v1272_v43 = vcombine.low %v1263_v36, %v1271_v37  ;;  %v991_v45 = vrot.slane %v3301_v25, %v3930_v23  ;;  %v1682_v46 = vsel %vm1585_vm3, %v1289_v30, 0 }
 0x2c6   : > { %v950_v47 = vcombine.high %v949_v22, %v3752_v19  ;;  %v1254_v48 = vrot.slane %v1247_v35, %v3937_v38  ;;  %v958_v50 = vrot.slane %v951_v39, %v3930_v23  ;;  %v966_v51 = vrot.slane %v3300_v40, %v3930_v23 }
 0x2c7   : > { %3440 = vmatmul.mubr.msk.bf16.vlgmr.msra.gmra.mxu1 %vm1585_vm3, %v1003_v34  ;;  %v1279_v49 = vrot.slane %v1272_v43, %v3937_v38  ;;  %v1728_v52 = vsel %vm1585_vm3, %v1292_v42, 0  ;;  %v925_v53 = vcombine.high %v924_v12, %v3752_v19  ;;  %v992_v55 = vcombine.low %v983_v44, %v991_v45 }
 0x2c8   : > { %3450 = vmatpush3.bf16.xpose.msra.mxu1 %v1682_v46  ;;  %3451 = vmatprep.mubr.msk.bf16.mxu1 %vm3746_vm2, %v3745_v18  ;;  %v1011_v57 = vshrl.u32 %v950_v47, 16  ;;  %v1296_v58 = vshrl.u32 %v1254_v48, 16  ;;  %v967_v59 = vcombine.low %v958_v50, %v966_v51  ;;  %v1255_v3 = vcombine.high %v1254_v48, %v3752_v19 }
 0x2c9   : > { %3461 = vmatprep.subr.bf16.mxu1 %v3745_v18  ;;  %v1297_v54 = vshrl.u32 %v1279_v49, 16  ;;  %v1295_v56 = vpack.i.b16 %v1279_v49, %v1254_v48  ;;  %v1009_v60 = vpack.i.b16 %v950_v47, %v925_v53  ;;  %v1010_v61 = vshrl.u32 %v925_v53, 16 }
 0x2ca   : > { %3446 = vmatmul.mubr.msk.bf16.vlgmr.msra.gmra.mxu0 %vm1585_vm3, %v1006_v41  ;;  %v1280_v63 = vcombine.high %v1279_v49, %v3752_v19  ;;  %v999_v2 = vrot.slane %v992_v55, %v3937_v38  ;;  %v974_v6 = vrot.slane %v967_v59, %v3937_v38  ;;  %v1302_v11 = vshrl.u32 %v1255_v3, 16 }
 0x2cb   : > { %3456 = vmatpush3.bf16.xpose.msra.mxu0 %v1728_v52  ;;  %3457 = vmatprep.mubr.msk.bf16.mxu0 %vm3746_vm2, %v3745_v18  ;;  %v1298_v62 = vpack.i.b16 %v1297_v54, %v1296_v58  ;;  %v1774_v0 = vsel %vm1585_vm3, %v1295_v56, 0  ;;  %v1012_v1 = vpack.i.b16 %v1011_v57, %v1010_v61  ;;  %v1957_v29 = vand.u32 127, %v538_v26 }
 0x2cc   : > { %3467 = vmatprep.subr.bf16.mxu0 %v3745_v18  ;;  %v1303_v7 = vshrl.u32 %v1280_v63, 16  ;;  %v1301_v8 = vpack.i.b16 %v1280_v63, %v1255_v3  ;;  %v1017_v9 = vshrl.u32 %v999_v2, 16  ;;  %v1015_v12 = vpack.i.b16 %v999_v2, %v974_v6 }
 0x2cd   : > { %v1820_v4 = vsel %vm1585_vm3, %v1298_v62, 0  ;;  %v1016_v13 = vshrl.u32 %v974_v6, 16  ;;  %v1000_v17 = vcombine.high %v999_v2, %v3752_v19  ;;  %v975_v21 = vcombine.high %v974_v6, %v3752_v19 }
 0x2ce   : > { %v1304_v14 = vpack.i.b16 %v1303_v7, %v1302_v11  ;;  %v1866_v15 = vsel %vm1585_vm3, %v1301_v8, 0  ;;  %vm4055_vm4 = vcmp.le.s32.totalorder %v1957_v29, %v3888_v27 }
 0x2cf   : > { %3452 = vmatmul.mubr.msk.bf16.vlgmr.msra.gmra.mxu1 %vm1585_vm3, %v1009_v60  ;;  %v1018_v16 = vpack.i.b16 %v1017_v9, %v1016_v13  ;;  %v1023_v22 = vshrl.u32 %v1000_v17, 16  ;;  %v1021_v24 = vpack.i.b16 %v1000_v17, %v975_v21  ;;  %v1022_v25 = vshrl.u32 %v975_v21, 16  ;;  %v1308_v17 = vpop.permute.xlu0 %1307 }
 0x2d0   : > { %3462 = vmatpush3.bf16.xpose.msra.mxu1 %v1774_v0  ;;  %3463 = vmatprep.mubr.msk.bf16.mxu1 %vm3746_vm2, %v3745_v18  ;;  %v1912_v5 = vsel %vm1585_vm3, %v1304_v14, 0  ;;  %v4112_v30 = vpack.i.b16 %v1308_v17, %v3919_v10 }
 0x2d1   : > { %3473 = vmatprep.subr.bf16.mxu1 %v3745_v18  ;;  %v1024_v28 = vpack.i.b16 %v1023_v22, %v1022_v25 }
 0x2d2   : > { %3458 = vmatmul.mubr.msk.bf16.vlgmr.msra.gmra.mxu0 %vm1585_vm3, %v1012_v1 }
 0x2d3   : > { %3468 = vmatpush3.bf16.xpose.msra.mxu0 %v1820_v4  ;;  %3469 = vmatprep.mubr.msk.bf16.mxu0 %vm3746_vm2, %v3745_v18 }
 0x2d4   : > { %3479 = vmatprep.subr.bf16.mxu0 %v3745_v18 }
 0x2d7   : > { %3464 = vmatmul.mubr.msk.bf16.vlgmr.msra.gmra.mxu1 %vm1585_vm3, %v1015_v12 }
 0x2d8   : > { %3474 = vmatpush3.bf16.xpose.msra.mxu1 %v1866_v15  ;;  %3475 = vmatprep.mubr.msk.bf16.mxu1 %vm3746_vm2, %v3745_v18 }
 0x2d9   : > { %3485 = vmatprep.subr.bf16.mxu1 %v3745_v18 }
 0x2da   : > { %3470 = vmatmul.mubr.msk.bf16.vlgmr.msra.gmra.mxu0 %vm1585_vm3, %v1018_v16 }
 0x2db   : > { %3480 = vmatpush3.bf16.xpose.msra.mxu0 %v1912_v5  ;;  %3481 = vmatprep.mubr.msk.bf16.mxu0 %vm3746_vm2, %v3745_v18 }
 0x2dc   : > { %3491 = vmatprep.subr.bf16.mxu0 %v3745_v18 }
 0x2df   : > { %3476 = vmatmul.mubr.msk.bf16.vlgmr.msra.gmra.mxu1 %vm1585_vm3, %v1021_v24 }
 0x2e0   : > { %3487 = vmatprep.mubr.msk.bf16.mxu1 %vm3746_vm2, %v3745_v18 }
 0x2e2   : > { %3482 = vmatmul.mubr.msk.bf16.vlgmr.msra.gmra.mxu0 %vm1585_vm3, %v1024_v28  ;;  %v1318_v28 = vshrl.u32 %v1308_v17, 16 }
 0x2e3   : > { %3493 = vmatprep.mubr.msk.bf16.mxu0 %vm3746_vm2, %v3745_v18 }
 0x387   : > { %v1626_v31 = vpop.f32.mrf.mxu1 }
 0x388   : > { %v1961_v32 = vsel %vm4055_vm4, %v1626_v31, -1e+30 }
 0x389   : > { %v3441_v33 = vpop.f32.mrf.mxu1  ;;  %v1969_v35 = vsel %vm1585_vm3, %v1961_v32, -inf }
 0x38a   : > { %v1672_v34 = vpop.f32.mrf.mxu0  ;;  %1970 = vmax.xlane.f32.xlu0 %v1969_v35  ;;  %v1317_v33 = vshrl.u32 %v3919_v10, 16 }
 0x38b   : > { %v1962_v36 = vsel %vm4055_vm4, %v1672_v34, -1e+30  ;;  %v1629_v37 = vpop.f32.mrf.mxu1 }
 0x38c   : > { %v3447_v39 = vpop.f32.mrf.mxu0  ;;  %v1972_v26 = vsel %vm1585_vm3, %v1962_v36, -inf }
 0x38d   : > { %1973 = vmax.xlane.f32.xlu1 %v1972_v26  ;;  %v3442_v40 = vpop.f32.mrf.mxu1 }
 0x38e   : > { %v1675_v41 = vpop.f32.mrf.mxu0 }
 0x38f   : > { %v1718_v43 = vpop.f32.mrf.mxu1 }
 0x390   : > { %v3448_v42 = vpop.f32.mrf.mxu0  ;;  %v4075_v4 = vsel %vm4055_vm4, %v1718_v43, -1e+30 }
 0x391   : > { %v3453_v44 = vpop.f32.mrf.mxu1  ;;  %v1975_v8 = vsel %vm1585_vm3, %v4075_v4, -inf }
 0x392   : > { %v1764_v45 = vpop.f32.mrf.mxu0 }
 0x393   : > { %v1721_v46 = vpop.f32.mrf.mxu1  ;;  %v4071_v3 = vsel %vm4055_vm4, %v1764_v45, -1e+30 }
 0x394   : > { %v3459_v47 = vpop.f32.mrf.mxu0  ;;  %v1978_v6 = vsel %vm1585_vm3, %v4071_v3, -inf }
 0x395   : > { %v3454_v48 = vpop.f32.mrf.mxu1 }
 0x396   : > { %v1767_v49 = vpop.f32.mrf.mxu0 }
 0x397   : > { %v1810_v51 = vpop.f32.mrf.mxu1 }
 0x398   : > { %v3460_v50 = vpop.f32.mrf.mxu0  ;;  %v4081_v7 = vsel %vm4055_vm4, %v1810_v51, -1e+30 }
 0x399   : > { %v3465_v52 = vpop.f32.mrf.mxu1  ;;  %v1981_v11 = vsel %vm1585_vm3, %v4081_v7, -inf }
 0x39a   : > { %v1856_v53 = vpop.f32.mrf.mxu0 }
 0x39b   : > { %v1813_v54 = vpop.f32.mrf.mxu1  ;;  %v4093_v12 = vsel %vm4055_vm4, %v1856_v53, -1e+30 }
 0x39c   : > { %v3471_v55 = vpop.f32.mrf.mxu0  ;;  %v1984_v14 = vsel %vm1585_vm3, %v4093_v12, -inf }
 0x39d   : > { %v3466_v56 = vpop.f32.mrf.mxu1 }
 0x39e   : > { %1309 = vrot.lane.b32.xlu1 %v3919_v10, %s3747_s1  ;;  %v1859_v57 = vpop.f32.mrf.mxu0 }
 0x39f   : > { %v1902_v59 = vpop.f32.mrf.mxu1 }
 0x3a0   : > { %v3472_v58 = vpop.f32.mrf.mxu0  ;;  %1311 = vrot.lane.b32.xlu0 %v3919_v10, %s3749_s12  ;;  %v4087_v9 = vsel %vm4055_vm4, %v1902_v59, -1e+30 }
 0x3a1   : > { %v3477_v60 = vpop.f32.mrf.mxu1  ;;  %v1987_v13 = vsel %vm1585_vm3, %v4087_v9, -inf }
 0x3a2   : > { %v1948_v61 = vpop.f32.mrf.mxu0 }
 0x3a3   : > { %v1905_v62 = vpop.f32.mrf.mxu1  ;;  %v4101_v15 = vsel %vm4055_vm4, %v1948_v61, -1e+30 }
 0x3a4   : > { %v3483_v63 = vpop.f32.mrf.mxu0  ;;  %v1990_v16 = vsel %vm1585_vm3, %v4101_v15, -inf }
 0x3a5   : > { %v3478_v0 = vpop.f32.mrf.mxu1 }
 0x3a6   : > { %v1951_v1 = vpop.f32.mrf.mxu0 }
 0x3a8   : > { %v3484_v2 = vpop.f32.mrf.mxu0 }
 0x3bf   : > { %1979 = vmax.xlane.f32.xlu0 %v1978_v6 }
 0x3c2   : > { %1976 = vmax.xlane.f32.xlu1 %v1975_v8 }
 0x3c3   : > { %1982 = vmax.xlane.f32.xlu0 %v1981_v11 }
 0x3c6   : > { %1988 = vmax.xlane.f32.xlu1 %v1987_v13 }
 0x3c7   : > { %1985 = vmax.xlane.f32.xlu0 %v1984_v14 }
 0x3cb   : > { %1991 = vmax.xlane.f32.xlu0 %v1990_v16 }
 0x413   : > { %v4105_v5 = vpop.xlane.xlu0 %1970 }
 0x414   : > { %v2017_v21 = vsub.f32 %v1961_v32, %v4105_v5  ;;  %v4117_v32 = vpack.i.b16 %v1318_v28, %v1317_v33 }
 0x416   : > { %v4108_v22 = vpop.xlane.xlu1 %1973  ;;  %v2025_v24 = vmul.f32 1.442695, %v2017_v21  ;;  %v1402_v10 = vrot.slane %v4117_v32, %v3930_v23 }
 0x417   : > { %v2018_v25 = vsub.f32 %v1962_v36, %v4108_v22  ;;  %v1312_v29 = vpop.permute.xlu0 %1311  ;;  %v1336_v36 = vrot.slane %v4112_v30, %v3930_v23 }
 0x418   : > { %3634 = vpow2.f32 %v2025_v24  ;;  %v1326_v35 = vshrl.u32 %v1312_v29, 16 }
 0x419   : > { %v2027_v31 = vmul.f32 1.442695, %v2018_v25 }
 0x41a   : > { %v1310_v34 = vpop.permute.xlu1 %1309 }
 0x41b   : > { %v4115_v37 = vpack.i.b16 %v1312_v29, %v1310_v34  ;;  %v1325_v39 = vshrl.u32 %v1310_v34, 16  ;;  %3636 = vpow2.f32 %v2027_v31 }
 0x41d   : > { %v4121_v26 = vpack.i.b16 %v1326_v35, %v1325_v39  ;;  %v1351_v40 = vrot.slane %v4115_v37, %v3930_v23  ;;  %v1395_v39 = vcombine.high %v4117_v32, %v3927_v20 }
 0x41f   : > { %v1359_v41 = vcombine.low %v1336_v36, %v1351_v40  ;;  %v1360_v42 = vcombine.high %v1336_v36, %v1351_v40  ;;  %v1417_v43 = vrot.slane %v4121_v26, %v3930_v23  ;;  %v1410_v35 = vcombine.high %v4121_v26, %v3927_v20 }
 0x420   : > { %v1344_v36 = vcombine.high %v4115_v37, %v3927_v20  ;;  %v1329_v40 = vcombine.high %v4112_v30, %v3927_v20 }
 0x421   : > { %v1367_v44 = vrot.slane %v1359_v41, %v3937_v38  ;;  %v1374_v45 = vrot.slane %v1360_v42, %v3937_v38  ;;  %v1425_v46 = vcombine.low %v1402_v10, %v1417_v43  ;;  %v1426_v47 = vcombine.high %v1402_v10, %v1417_v43 }
 0x422   : > { %v1424_v41 = vrot.slane %v1410_v35, %v3930_v23  ;;  %v1409_v42 = vrot.slane %v1395_v39, %v3930_v23  ;;  %v1358_v26 = vrot.slane %v1344_v36, %v3930_v23  ;;  %v1343_v10 = vrot.slane %v1329_v40, %v3930_v23 }
 0x423   : > { %v1461_v48 = vcombine.low %v1367_v44, %v1374_v45  ;;  %v3306_v49 = vcombine.high %v1367_v44, %v1374_v45  ;;  %v1433_v50 = vrot.slane %v1425_v46, %v3937_v38  ;;  %v1440_v51 = vrot.slane %v1426_v47, %v3937_v38 }
 0x424   : > { %v1441_v43 = vcombine.low %v1409_v42, %v1424_v41  ;;  %v1442_v44 = vcombine.high %v1409_v42, %v1424_v41  ;;  %v1375_v45 = vcombine.low %v1343_v10, %v1358_v26  ;;  %v1376_v46 = vcombine.high %v1343_v10, %v1358_v26 }
 0x425   : > { %v1468_v52 = vrot.slane %v1461_v48, %v3930_v23  ;;  %v1476_v53 = vrot.slane %v3306_v49, %v3930_v23  ;;  %v1486_v54 = vcombine.low %v1433_v50, %v1440_v51  ;;  %v3307_v55 = vcombine.high %v1433_v50, %v1440_v51  ;;  %v3635_v56 = vpop.eup %3634 }
 0x426   : > { %v2049_v61 = vsel %vm1585_vm3, %v3635_v56, 0.0  ;;  %v2081_v28 = vpack.c.bf16 %v3635_v56, %v3635_v56  ;;  %v1449_v32 = vrot.slane %v1441_v43, %v3937_v38  ;;  %v1456_v47 = vrot.slane %v1442_v44, %v3937_v38 }
 0x427   : > { %v1477_v57 = vcombine.low %v1468_v52, %v1476_v53  ;;  %v1493_v58 = vrot.slane %v1486_v54, %v3930_v23  ;;  %v1501_v59 = vrot.slane %v3307_v55, %v3930_v23  ;;  %2050 = vadd.xlane.f32.xlu1 %v2049_v61  ;;  %v1383_v37 = vrot.slane %v1375_v45, %v3937_v38 }
 0x428   : > { %v3637_v60 = vpop.eup %3636  ;;  %v1390_v20 = vrot.slane %v1376_v46, %v3937_v38  ;;  %v1536_v30 = vcombine.low %v1449_v32, %v1456_v47  ;;  %v3309_v48 = vcombine.high %v1449_v32, %v1456_v47 }
 0x429   : > { %v1484_v62 = vrot.slane %v1477_v57, %v3937_v38  ;;  %v2052_v63 = vsel %vm1585_vm3, %v3637_v60, 0.0  ;;  %v1502_v0 = vcombine.low %v1493_v58, %v1501_v59  ;;  %v2082_v33 = vpack.c.bf16 %v3637_v60, %v3637_v60 }
 0x42a   : > { %2053 = vadd.xlane.f32.xlu0 %v2052_v63  ;;  %v1511_v49 = vcombine.low %v1383_v37, %v1390_v20  ;;  %v3308_v50 = vcombine.high %v1383_v37, %v1390_v20  ;;  %v1543_v53 = vrot.slane %v1536_v30, %v3930_v23  ;;  %v1551_v54 = vrot.slane %v3309_v48, %v3930_v23 }
 0x42b   : > { %v1485_v1 = vcombine.high %v1484_v62, %v3752_v19  ;;  %v1509_v2 = vrot.slane %v1502_v0, %v3937_v38  ;;  %v1564_v8 = vshrl.u32 %v1484_v62, 16 }
 0x42c   : > { %v1518_v58 = vrot.slane %v1511_v49, %v3930_v23  ;;  %v1526_v59 = vrot.slane %v3308_v50, %v3930_v23  ;;  %v1552_v63 = vcombine.low %v1543_v53, %v1551_v54  ;;  %v1994_v53 = vsub.f32 -inf, %v4108_v22 }
 0x42d   : > { %v1563_v6 = vpack.i.b16 %v1509_v2, %v1484_v62  ;;  %v1565_v11 = vshrl.u32 %v1509_v2, 16  ;;  %v1510_v13 = vcombine.high %v1509_v2, %v3752_v19  ;;  %v1570_v14 = vshrl.u32 %v1485_v1, 16 }
 0x42e   : > { %v1527_v2 = vcombine.low %v1518_v58, %v1526_v59  ;;  %v1993_v54 = vsub.f32 -inf, %v4105_v5 }
 0x42f   : > { %v2094_v16 = vsel %vm2092_vm5, %v1563_v6, 0  ;;  %v1566_v17 = vpack.i.b16 %v1565_v11, %v1564_v8  ;;  %v1569_v21 = vpack.i.b16 %v1510_v13, %v1485_v1  ;;  %v1571_v24 = vshrl.u32 %v1510_v13, 16 }
 0x430   : > { %3486 = vmatpush3.bf16.msra.mxu1 %v2094_v16  ;;  %v1559_v11 = vrot.slane %v1552_v63, %v3937_v38 }
 0x431   : > { %v2140_v25 = vsel %vm2092_vm5, %v1566_v17, 0  ;;  %3497 = vmatprep.subr.bf16.mxu1 %v3745_v18  ;;  %v1572_v29 = vpack.i.b16 %v1571_v24, %v1570_v14  ;;  %v2186_v31 = vsel %vm2092_vm5, %v1569_v21, 0  ;;  %v1534_v14 = vrot.slane %v1527_v2, %v3937_v38 }
 0x432   : > { %3492 = vmatpush3.bf16.msra.mxu0 %v2140_v25  ;;  %v1577_v16 = vshrl.u32 %v1559_v11, 16  ;;  %v1560_v25 = vcombine.high %v1559_v11, %v3752_v19 }
 0x433   : > { %3488 = vmatmul.mubr.msk.bf16.vlgmr.msra.gmra.mxu1 %vm1585_vm3, %v2081_v28  ;;  %3503 = vmatprep.subr.bf16.mxu0 %v3745_v18  ;;  %v2232_v34 = vsel %vm2092_vm5, %v1572_v29, 0  ;;  %v1576_v21 = vshrl.u32 %v1534_v14, 16 }
 0x434   : > { %3498 = vmatpush3.bf16.msra.mxu1 %v2186_v31  ;;  %3499 = vmatprep.mubr.msk.bf16.mxu1 %vm3746_vm2, %v3745_v18  ;;  %v1575_v31 = vpack.i.b16 %v1559_v11, %v1534_v14  ;;  %v1583_v36 = vshrl.u32 %v1560_v25, 16 }
 0x435   : > { %3494 = vmatmul.mubr.msk.bf16.vlgmr.msra.gmra.mxu0 %vm1585_vm3, %v2082_v33  ;;  %3509 = vmatprep.subr.bf16.mxu1 %v3745_v18  ;;  %v1578_v24 = vpack.i.b16 %v1577_v16, %v1576_v21  ;;  %v1535_v33 = vcombine.high %v1534_v14, %v3752_v19 }
 0x436   : > { %3504 = vmatpush3.bf16.msra.mxu0 %v2232_v34  ;;  %3505 = vmatprep.mubr.msk.bf16.mxu0 %vm3746_vm2, %v3745_v18  ;;  %v2278_v41 = vsel %vm2092_vm5, %v1575_v31, 0 }
 0x437   : > { %3515 = vmatprep.subr.bf16.mxu0 %v3745_v18  ;;  %v1582_v42 = vshrl.u32 %v1535_v33, 16  ;;  %v1581_v32 = vpack.i.b16 %v1560_v25, %v1535_v33 }
 0x439   : > { %v1584_v43 = vpack.i.b16 %v1583_v36, %v1582_v42  ;;  %v2370_v48 = vsel %vm2092_vm5, %v1581_v32, 0 }
 0x43b   : > { %v2416_v47 = vsel %vm2092_vm5, %v1584_v43, 0 }
 0x448   : > { %v4173_v51 = vpop.xlane.xlu0 %1979 }
 0x449   : > { %v2020_v52 = vsub.f32 %v4071_v3, %v4173_v51  ;;  %v1996_v58 = vsub.f32 -inf, %v4173_v51 }
 0x44b   : > { %v4179_v55 = vpop.xlane.xlu1 %1976  ;;  %v2031_v56 = vmul.f32 1.442695, %v2020_v52  ;;  %v2007_v2 = vmul.f32 1.442695, %v1996_v58 }
 0x44c   : > { %v2019_v57 = vsub.f32 %v4075_v4, %v4179_v55  ;;  %v4185_v60 = vpop.xlane.xlu0 %1982  ;;  %v1995_v63 = vsub.f32 -inf, %v4179_v55 }
 0x44d   : > { %3638 = vpow2.f32 %v2031_v56  ;;  %v2021_v3 = vsub.f32 %v4081_v7, %v4185_v60  ;;  %v1997_v51 = vsub.f32 -inf, %v4185_v60 }
 0x44e   : > { %v2029_v61 = vmul.f32 1.442695, %v2019_v57  ;;  %v2003_v57 = vmul.f32 1.442695, %v1994_v53  ;;  %v2005_v11 = vmul.f32 1.442695, %v1995_v63 }
 0x44f   : > { %v4189_v62 = vpop.xlane.xlu1 %1988  ;;  %v2033_v1 = vmul.f32 1.442695, %v2021_v3  ;;  %v2001_v3 = vmul.f32 1.442695, %v1993_v54 }
 0x450   : > { %v2023_v0 = vsub.f32 %v4087_v9, %v4189_v62  ;;  %3640 = vpow2.f32 %v2029_v61  ;;  %v4193_v4 = vpop.xlane.xlu0 %1985 }
 0x451   : > { %3642 = vpow2.f32 %v2033_v1  ;;  %v2022_v8 = vsub.f32 %v4093_v12, %v4193_v4  ;;  %v1998_v5 = vsub.f32 -inf, %v4193_v4 }
 0x452   : > { %v2037_v6 = vmul.f32 1.442695, %v2023_v0 }
 0x453   : > { %v2035_v13 = vmul.f32 1.442695, %v2022_v8 }
 0x454   : > { %v4198_v7 = vpop.xlane.xlu0 %1991  ;;  %3644 = vpow2.f32 %v2037_v6 }
 0x455   : > { %v2024_v9 = vsub.f32 %v4101_v15, %v4198_v7  ;;  %3646 = vpow2.f32 %v2035_v13  ;;  %v2324_v15 = vsel %vm2092_vm5, %v1578_v24, 0  ;;  %v2011_v13 = vmul.f32 1.442695, %v1998_v5 }
 0x456   : > { %v2000_v55 = vsub.f32 -inf, %v4198_v7 }
 0x457   : > { %v2039_v17 = vmul.f32 1.442695, %v2024_v9  ;;  %v2009_v9 = vmul.f32 1.442695, %v1997_v51 }
 0x459   : > { %3648 = vpow2.f32 %v2039_v17  ;;  %v1999_v17 = vsub.f32 -inf, %v4189_v62 }
 0x45a   : > { %v3639_v12 = vpop.eup %3638  ;;  %3650 = vpow2.f32 %v2003_v57 }
 0x45b   : > { %v2058_v28 = vsel %vm1585_vm3, %v3639_v12, 0.0  ;;  %v2084_v29 = vpack.c.bf16 %v3639_v12, %v3639_v12  ;;  %3652 = vpow2.f32 %v2001_v3  ;;  %v2015_v12 = vmul.f32 1.442695, %v2000_v55 }
 0x45c   : > { %2059 = vadd.xlane.f32.xlu0 %v2058_v28  ;;  %3654 = vpow2.f32 %v2007_v2  ;;  %v2013_v33 = vmul.f32 1.442695, %v1999_v17 }
 0x45d   : > { %v3641_v34 = vpop.eup %3640  ;;  %3506 = vmatmul.mubr.msk.bf16.vlgmr.msra.gmra.mxu0 %vm1585_vm3, %v2084_v29  ;;  %3656 = vpow2.f32 %v2005_v11 }
 0x45e   : > { %v2055_v35 = vsel %vm1585_vm3, %v3641_v34, 0.0  ;;  %v2083_v39 = vpack.c.bf16 %v3641_v34, %v3641_v34  ;;  %v3643_v40 = vpop.eup %3642  ;;  %3516 = vmatpush3.bf16.msra.mxu0 %v2324_v15  ;;  %3517 = vmatprep.mubr.msk.bf16.mxu0 %vm3746_vm2, %v3745_v18  ;;  %3658 = vpow2.f32 %v2011_v13 }
 0x45f   : > { %2056 = vadd.xlane.f32.xlu1 %v2055_v35  ;;  %3527 = vmatprep.subr.bf16.mxu0 %v3745_v18  ;;  %v2061_v10 = vsel %vm1585_vm3, %v3643_v40, 0.0  ;;  %v2085_v20 = vpack.c.bf16 %v3643_v40, %v3643_v40  ;;  %3660 = vpow2.f32 %v2009_v9 }
 0x460   : > { %3500 = vmatmul.mubr.msk.bf16.vlgmr.msra.gmra.mxu1 %vm1585_vm3, %v2083_v39  ;;  %3662 = vpow2.f32 %v2015_v12 }
 0x461   : > { %3510 = vmatpush3.bf16.msra.mxu1 %v2278_v41  ;;  %v3645_v26 = vpop.eup %3644  ;;  %3511 = vmatprep.mubr.msk.bf16.mxu1 %vm3746_vm2, %v3745_v18 }
 0x462   : > { %3521 = vmatprep.subr.bf16.mxu1 %v3745_v18  ;;  %v3647_v44 = vpop.eup %3646  ;;  %v2067_v37 = vsel %vm1585_vm3, %v3645_v26, 0.0  ;;  %v2087_v52 = vpack.c.bf16 %v3645_v26, %v3645_v26 }
 0x463   : > { %2062 = vadd.xlane.f32.xlu1 %v2061_v10  ;;  %v2064_v45 = vsel %vm1585_vm3, %v3647_v44, 0.0  ;;  %v2086_v46 = vpack.c.bf16 %v3647_v44, %v3647_v44 }
 0x464   : > { %2065 = vadd.xlane.f32.xlu0 %v2064_v45 }
 0x465   : > { %3518 = vmatmul.mubr.msk.bf16.vlgmr.msra.gmra.mxu0 %vm1585_vm3, %v2086_v46 }
 0x466   : > { %v3649_v30 = vpop.eup %3648  ;;  %3528 = vmatpush3.bf16.msra.mxu0 %v2416_v47  ;;  %3529 = vmatprep.mubr.msk.bf16.mxu0 %vm3746_vm2, %v3745_v18 }
 0x467   : > { %2068 = vadd.xlane.f32.xlu1 %v2067_v37  ;;  %v2070_v49 = vsel %vm1585_vm3, %v3649_v30, 0.0  ;;  %3541 = vmatprep.subr.bf16.mxu0 %v3745_v18  ;;  %v2088_v50 = vpack.c.bf16 %v3649_v30, %v3649_v30  ;;  %v3651_v14 = vpop.eup %3650 }
 0x468   : > { %3512 = vmatmul.mubr.msk.bf16.vlgmr.msra.gmra.mxu1 %vm1585_vm3, %v2085_v20  ;;  %2071 = vadd.xlane.f32.xlu0 %v2070_v49  ;;  %v3653_v16 = vpop.eup %3652  ;;  %v2042_v24 = vmul.f32 0.0, %v3651_v14 }
 0x469   : > { %3522 = vmatpush3.bf16.msra.mxu1 %v2370_v48  ;;  %3523 = vmatprep.mubr.msk.bf16.mxu1 %vm3746_vm2, %v3745_v18  ;;  %v3655_v25 = vpop.eup %3654  ;;  %v2041_v29 = vmul.f32 0.0, %v3653_v16 }
 0x46a   : > { %3533 = vmatprep.subr.bf16.mxu1 %v3745_v18  ;;  %v3657_v4 = vpop.eup %3656  ;;  %v2044_v15 = vmul.f32 0.0, %v3655_v25 }
 0x46b   : > { %v2043_v39 = vmul.f32 0.0, %v3657_v4  ;;  %v3659_v36 = vpop.eup %3658 }
 0x46c   : > { %v3661_v40 = vpop.eup %3660  ;;  %v2046_v26 = vmul.f32 0.0, %v3659_v36 }
 0x46d   : > { %3530 = vmatmul.mubr.msk.bf16.vlgmr.msra.gmra.mxu0 %vm1585_vm3, %v2088_v50  ;;  %v2045_v43 = vmul.f32 0.0, %v3661_v40  ;;  %v3663_v44 = vpop.eup %3662 }
 0x46e   : > { %3545 = vmatprep.mubr.msk.bf16.mxu0 %vm3746_vm2, %v3745_v18 }
 0x470   : > { %3524 = vmatmul.mubr.msk.bf16.vlgmr.msra.gmra.mxu1 %vm1585_vm3, %v2087_v52  ;;  %v4245_v52 = vmul.f32 0.0, %v3663_v44 }
 0x471   : > { %3537 = vmatprep.mubr.msk.bf16.mxu1 %vm3746_vm2, %v3745_v18 }
 0x4b0   : > { %v2051_v28 = vpop.xlane.xlu1 %2050 }
 0x4b1   : > { %v2073_v34 = vadd.f32 %v2051_v28, %v2041_v29 }
 0x4b3   : > { %v2054_v21 = vpop.xlane.xlu0 %2053 }
 0x4b4   : > { %v2074_v31 = vadd.f32 %v2054_v21, %v2042_v24 }
 0x4b6   : > { %3664 = vrcp.f32 %v2074_v31 }
 0x4b7   : > { %3666 = vpow2.f32 %v2013_v33 }
 0x4b8   : > { %3668 = vrcp.f32 %v2073_v34 }
 0x4c3   : > { %v3665_v32 = vpop.eup %3664 }
 0x4c4   : > { %v3667_v37 = vpop.eup %3666 }
 0x4c5   : > { %v3669_v30 = vpop.eup %3668  ;;  %v4247_v58 = vmul.f32 0.0, %v3667_v37 }
 0x4e5   : > { %v2060_v60 = vpop.xlane.xlu0 %2059 }
 0x4e6   : > { %v2076_v7 = vadd.f32 %v2060_v60, %v2044_v15 }
 0x4e8   : > { %v2057_v35 = vpop.xlane.xlu1 %2056  ;;  %3670 = vrcp.f32 %v2076_v7 }
 0x4e9   : > { %v2075_v62 = vadd.f32 %v2057_v35, %v2043_v39 }
 0x4eb   : > { %3672 = vrcp.f32 %v2075_v62 }
 0x4ec   : > { %v2063_v42 = vpop.xlane.xlu1 %2062 }
 0x4ed   : > { %v2066_v41 = vpop.xlane.xlu0 %2065  ;;  %v2077_v47 = vadd.f32 %v2063_v42, %v2045_v43 }
 0x4ee   : > { %v2078_v45 = vadd.f32 %v2066_v41, %v2046_v26 }
 0x4f0   : > { %3674 = vrcp.f32 %v2078_v45  ;;  %v2069_v50 = vpop.xlane.xlu1 %2068 }
 0x4f1   : > { %v2072_v48 = vpop.xlane.xlu0 %2071  ;;  %3676 = vrcp.f32 %v2077_v47  ;;  %v2079_v2 = vadd.f32 %v2069_v50, %v4247_v58 }
 0x4f3   : > { %v2130_v56 = vpop.f32.mrf.mxu1 }
 0x4f4   : > { %v2458_v46 = vadd.f32 %v2130_v56, %v2041_v29  ;;  %v2080_v56 = vadd.f32 %v2072_v48, %v4245_v52 }
 0x4f5   : > { %v3489_v59 = vpop.f32.mrf.mxu1  ;;  %v2176_v61 = vpop.f32.mrf.mxu0 }
 0x4f6   : > { %v2459_v10 = vadd.f32 %v2176_v61, %v2042_v24  ;;  %v2474_v53 = vmul.f32 %v3669_v30, %v2458_v46  ;;  %v3671_v57 = vpop.eup %3670  ;;  %3678 = vrcp.f32 %v2080_v56 }
 0x4f7   : > { %v2133_v0 = vpop.f32.mrf.mxu1  ;;  %v3495_v1 = vpop.f32.mrf.mxu0  ;;  %3680 = vrcp.f32 %v2079_v2 }
 0x4f8   : > { %v2475_v20 = vmul.f32 %v3665_v32, %v2459_v10  ;;  %v3673_v1 = vpop.eup %3672  ;;  %v2482_v11 = vpack.c.bf16 %v2474_v53, %v2474_v53 }
 0x4f9   : > { %v3490_v6 = vpop.f32.mrf.mxu1  ;;  %v2179_v8 = vpop.f32.mrf.mxu0 }
 0x4fa   : > { %v2516_v3 = vpack.c.bf16 %v2475_v20, %v2475_v20  ;;  %v2489_v21 = vrot.slane %v2482_v11, %v3930_v23 }
 0x4fb   : > { %v3496_v22 = vpop.f32.mrf.mxu0 }
 0x4fc   : > { %v2523_v14 = vrot.slane %v2516_v3, %v3930_v23 }
 0x4fd   : > { %v3675_v62 = vpop.eup %3674 }
 0x51d   : > { %v2268_v49 = vpop.f32.mrf.mxu0 }
 0x51e   : > { %v2461_v54 = vadd.f32 %v2268_v49, %v2044_v15 }
 0x51f   : > { %v3507_v61 = vpop.f32.mrf.mxu0 }
 0x520   : > { %v2222_v59 = vpop.f32.mrf.mxu1  ;;  %v2477_v63 = vmul.f32 %v3671_v57, %v2461_v54 }
 0x521   : > { %v2460_v0 = vadd.f32 %v2222_v59, %v2043_v39  ;;  %v2271_v8 = vpop.f32.mrf.mxu0 }
 0x522   : > { %v3501_v6 = vpop.f32.mrf.mxu1  ;;  %v2524_v22 = vpack.c.bf16 %v2477_v63, %v2477_v63 }
 0x523   : > { %v2476_v5 = vmul.f32 %v3673_v1, %v2460_v0  ;;  %v3508_v13 = vpop.f32.mrf.mxu0 }
 0x524   : > { %v2225_v51 = vpop.f32.mrf.mxu1  ;;  %v2531_v9 = vrot.slane %v2524_v22, %v3930_v23 }
 0x525   : > { %v2490_v55 = vpack.c.bf16 %v2476_v5, %v2476_v5  ;;  %v2360_v17 = vpop.f32.mrf.mxu0 }
 0x526   : > { %v3502_v16 = vpop.f32.mrf.mxu1  ;;  %v2532_v24 = vcombine.low %v2523_v14, %v2531_v9  ;;  %v2533_v25 = vcombine.high %v2523_v14, %v2531_v9  ;;  %v2463_v28 = vadd.f32 %v2360_v17, %v2046_v26  ;;  %v3677_v26 = vpop.eup %3676 }
 0x527   : > { %v2497_v12 = vrot.slane %v2490_v55, %v3930_v23  ;;  %v3519_v31 = vpop.f32.mrf.mxu0  ;;  %v3679_v6 = vpop.eup %3678 }
 0x528   : > { %v2314_v29 = vpop.f32.mrf.mxu1  ;;  %v2540_v4 = vrot.slane %v2532_v24, %v3937_v38  ;;  %v2547_v33 = vrot.slane %v2533_v25, %v3937_v38  ;;  %v2479_v46 = vmul.f32 %v3675_v62, %v2463_v28  ;;  %v3681_v14 = vpop.eup %3680 }
 0x529   : > { %v2498_v60 = vcombine.low %v2489_v21, %v2497_v12  ;;  %v2499_v34 = vcombine.high %v2489_v21, %v2497_v12  ;;  %v2363_v35 = vpop.f32.mrf.mxu0  ;;  %v2462_v39 = vadd.f32 %v2314_v29, %v2045_v43 }
 0x52a   : > { %v3513_v15 = vpop.f32.mrf.mxu1  ;;  %v2548_v7 = vcombine.high %v2540_v4, %v3752_v19  ;;  %v2549_v10 = vcombine.high %v2547_v33, %v3752_v19  ;;  %v2623_v44 = vshrl.u32 %v2540_v4, 16  ;;  %v2639_v45 = vshrl.u32 %v2547_v33, 16 }
 0x52b   : > { %v2506_v36 = vrot.slane %v2498_v60, %v3937_v38  ;;  %v2513_v40 = vrot.slane %v2499_v34, %v3937_v38  ;;  %v3520_v42 = vpop.f32.mrf.mxu0  ;;  %v2478_v53 = vmul.f32 %v3677_v26, %v2462_v39  ;;  %v2584_v9 = vpack.c.bf16 %v2479_v46, %v2479_v46 }
 0x52c   : > { %v2317_v41 = vpop.f32.mrf.mxu1  ;;  %v2631_v48 = vshrl.u32 %v2548_v7, 16  ;;  %v2647_v63 = vshrl.u32 %v2549_v10, 16 }
 0x52d   : > { %v2514_v32 = vcombine.high %v2506_v36, %v3752_v19  ;;  %v2515_v47 = vcombine.high %v2513_v40, %v3752_v19  ;;  %v2620_v37 = vpack.i.b16 %v2540_v4, %v2506_v36  ;;  %v2622_v20 = vshrl.u32 %v2506_v36, 16  ;;  %v2452_v30 = vpop.f32.mrf.mxu0 }
 0x52e   : > { %v3514_v43 = vpop.f32.mrf.mxu1  ;;  %v2636_v49 = vpack.i.b16 %v2547_v33, %v2513_v40  ;;  %v2638_v50 = vshrl.u32 %v2513_v40, 16  ;;  %v2465_v2 = vadd.f32 %v2452_v30, %v4245_v52  ;;  %v2550_v21 = vpack.c.bf16 %v2478_v53, %v2478_v53 }
 0x52f   : > { %v2624_v54 = vpack.i.b16 %v2623_v44, %v2622_v20  ;;  %v2628_v57 = vpack.i.b16 %v2548_v7, %v2514_v32  ;;  %v2630_v59 = vshrl.u32 %v2514_v32, 16  ;;  %v2644_v61 = vpack.i.b16 %v2549_v10, %v2515_v47  ;;  %v3531_v3 = vpop.f32.mrf.mxu0 }
 0x530   : > { %v2406_v56 = vpop.f32.mrf.mxu1  ;;  %v2640_v0 = vpack.i.b16 %v2639_v45, %v2638_v50  ;;  %v2646_v1 = vshrl.u32 %v2515_v47, 16  ;;  %v2682_v51 = vcombine.low %v2620_v37, %v2636_v49  ;;  %v2481_v55 = vmul.f32 %v3679_v6, %v2465_v2 }
 0x531   : > { %v2464_v8 = vadd.f32 %v2406_v56, %v4247_v58  ;;  %v2455_v22 = vpop.f32.mrf.mxu0  ;;  %v2632_v5 = vpack.i.b16 %v2631_v48, %v2630_v59  ;;  %v2690_v13 = vcombine.low %v2628_v57, %v2644_v61  ;;  %v2591_v60 = vrot.slane %v2584_v9, %v3930_v23 }
 0x532   : > { %v3525_v11 = vpop.f32.mrf.mxu1  ;;  %v2648_v16 = vpack.i.b16 %v2647_v63, %v2646_v1  ;;  %v2732_v17 = vcombine.low %v2624_v54, %v2640_v0  ;;  %v2689_v28 = vrot.slane %v2682_v51, %v3930_v23  ;;  %v2592_v29 = vpack.c.bf16 %v2481_v55, %v2481_v55 }
 0x533   : > { %v2480_v24 = vmul.f32 %v3681_v14, %v2464_v8  ;;  %v3532_v12 = vpop.f32.mrf.mxu0  ;;  %v2697_v52 = vrot.slane %v2690_v13, %v3930_v23  ;;  %v2557_v7 = vrot.slane %v2550_v21, %v3930_v23  ;;  %v3618_v8 = vld [vmem:[%s3857_s19 + $0x8] sm:$0xff]   ;;  %v3619_v13 = vld [vmem:[%s3857_s19] sm:$0xff]   ;;  %s3120_s19 = sshll.u32 %s3756_s14, 4  ;;  %s3121_s19 = int_to_ptr.vmem [resolvable:$true] %s3120_s19 }
 0x534   : > { %v2409_v25 = vpop.f32.mrf.mxu1  ;;  %v2740_v58 = vcombine.low %v2632_v5, %v2648_v16  ;;  %v2599_v34 = vrot.slane %v2592_v29, %v3930_v23  ;;  %v2739_v15 = vrot.slane %v2732_v17, %v3930_v23  ;;  %3534 = vmatpush3.bf16.msra.mxu1 %v3618_v8  ;;  %p3700_p10 = scmp.lt.s32.totalorder %s3121_s19, %s3121_s19 }
 0x535   : > { %v2558_v31 = vpack.c.bf16 %v2480_v24, %v2480_v24  ;;  %v2714_v33 = vcombine.low %v2689_v28, %v2697_v52  ;;  %3535 = vmatprep.subr.bf16.mxu1 %v3745_v18 }
 0x536   : > { %v3526_v4 = vpop.f32.mrf.mxu1  ;;  %v2747_v35 = vrot.slane %v2740_v58, %v3930_v23  ;;  %v2600_v62 = vcombine.low %v2591_v60, %v2599_v34  ;;  %v2601_v36 = vcombine.high %v2591_v60, %v2599_v34 }
 0x537   : > { %v2565_v39 = vrot.slane %v2558_v31, %v3930_v23  ;;  %v2721_v55 = vrot.slane %v2714_v33, %v3937_v38 }
 0x538   : > { %v2764_v40 = vcombine.low %v2739_v15, %v2747_v35  ;;  %v2608_v26 = vrot.slane %v2600_v62, %v3937_v38  ;;  %v2615_v10 = vrot.slane %v2601_v36, %v3937_v38  ;;  %3536 = vmatpush3.bf16.msra.mxu1 %v3619_v13  ;;  %v2815_v36 = vsub.s32 5, %v3888_v27 }
 0x539   : > { %v2566_v41 = vcombine.low %v2557_v7, %v2565_v39  ;;  %v2567_v42 = vcombine.high %v2557_v7, %v2565_v39  ;;  %3549 = vmatprep.subr.bf16.mxu1 %v3745_v18 }
 0x53a   : > { %v2616_v46 = vcombine.high %v2608_v26, %v3752_v19  ;;  %v2617_v32 = vcombine.high %v2615_v10, %v3752_v19  ;;  %v2655_v47 = vshrl.u32 %v2608_v26, 16  ;;  %v2671_v49 = vshrl.u32 %v2615_v10, 16 }
 0x53b   : > { %v2574_v44 = vrot.slane %v2566_v41, %v3937_v38  ;;  %v2581_v45 = vrot.slane %v2567_v42, %v3937_v38  ;;  %v2771_v25 = vrot.slane %v2764_v40, %v3937_v38  ;;  %v3690_v40 = vld [vmem:[%s3837_s21] sm:$0xff] }
 0x53c   : > { %v2663_v48 = vshrl.u32 %v2616_v46, 16  ;;  %v2679_v56 = vshrl.u32 %v2617_v32, 16  ;;  %v2816_v41 = vrot.slane %v3690_v40, %v2815_v36 }
 0x53d   : > { %v2582_v37 = vcombine.high %v2574_v44, %v3752_v19  ;;  %v2583_v20 = vcombine.high %v2581_v45, %v3752_v19  ;;  %v2652_v43 = vpack.i.b16 %v2608_v26, %v2574_v44  ;;  %v2654_v30 = vshrl.u32 %v2574_v44, 16  ;;  %v3691_v44 = vld [vmem:[#allocation2] sm:$0xff] }
 0x53e   : > { %v2668_v50 = vpack.i.b16 %v2615_v10, %v2581_v45  ;;  %v2670_v53 = vshrl.u32 %v2581_v45, 16 }
 0x53f   : > { %v2656_v54 = vpack.i.b16 %v2655_v47, %v2654_v30  ;;  %v2660_v57 = vpack.i.b16 %v2616_v46, %v2582_v37  ;;  %v2662_v59 = vshrl.u32 %v2582_v37, 16  ;;  %v2676_v61 = vpack.i.b16 %v2617_v32, %v2583_v20 }
 0x540   : > { %v2672_v3 = vpack.i.b16 %v2671_v49, %v2670_v53  ;;  %v2678_v63 = vshrl.u32 %v2583_v20, 16  ;;  %v2698_v0 = vcombine.low %v2652_v43, %v2668_v50  ;;  %v3692_v20 = vld [vmem:[#allocation2 + $0x8] sm:$0xff] }
 0x541   : > { %v2664_v1 = vpack.i.b16 %v2663_v48, %v2662_v59  ;;  %v2706_v2 = vcombine.low %v2660_v57, %v2676_v61 }
 0x542   : > { %v2680_v6 = vpack.i.b16 %v2679_v56, %v2678_v63  ;;  %v2748_v19 = vcombine.low %v2656_v54, %v2672_v3  ;;  %v2705_v11 = vrot.slane %v2698_v0, %v3930_v23  ;;  %v3620_v63 = vld [vmem:[%s3862_s22 + $0x8] sm:$0xff]   ;;  %v3621_v0 = vld [vmem:[%s3862_s22] sm:$0xff]  }
 0x543   : > { %v2713_v22 = vrot.slane %v2706_v2, %v3930_v23  ;;  %3542 = vmatpush3.bf16.msra.mxu0 %v3620_v63 }
 0x544   : > { %v2756_v5 = vcombine.low %v2664_v1, %v2680_v6  ;;  %v2755_v14 = vrot.slane %v2748_v19, %v3930_v23  ;;  %3543 = vmatprep.subr.bf16.mxu0 %v3745_v18 }
 0x545   : > { %v2722_v51 = vcombine.low %v2705_v11, %v2713_v22  ;;  %v2902_v22 = vsub.s32 6, %v3888_v27 }
 0x546   : > { %v2763_v9 = vrot.slane %v2756_v5, %v3930_v23 }
 0x547   : > { %v2729_v16 = vrot.slane %v2722_v51, %v3937_v38  ;;  %3544 = vmatpush3.bf16.msra.mxu0 %v3621_v0  ;;  %v2903_v13 = vrot.slane %v3690_v40, %v2902_v22 }
 0x548   : > { %v2772_v17 = vcombine.low %v2755_v14, %v2763_v9  ;;  %v2908_v14 = vsub.s32 7, %v3888_v27  ;;  %v3623_v27 = vld [vmem:[%s3868_s26 + $0x30] sm:$0xff]  }
 0x549   : > { %v2731_v21 = vcombine.high %v2721_v55, %v2729_v16  ;;  %v2730_v24 = vcombine.low %v2721_v55, %v2729_v16 }
 0x54a   : > { %v2779_v12 = vrot.slane %v2772_v17, %v3937_v38  ;;  %v2909_v17 = vrot.slane %v3690_v40, %v2908_v14 }
 0x54b   : > { %v2785_v29 = vshrl.u32 %v2730_v24, 16  ;;  %v2791_v58 = vshrl.u32 %v2731_v21, 16 }
 0x54c   : > { %v2781_v28 = vcombine.high %v2771_v25, %v2779_v12  ;;  %v2780_v52 = vcombine.low %v2771_v25, %v2779_v12 }
 0x54e   : > { %v2790_v31 = vpack.i.b16 %v2781_v28, %v2731_v21  ;;  %v2786_v23 = vshrl.u32 %v2780_v52, 16  ;;  %v2792_v4 = vshrl.u32 %v2781_v28, 16  ;;  %v2784_v33 = vpack.i.b16 %v2780_v52, %v2730_v24  ;;  %v3622_v28 = vld [vmem:[%s3868_s26 + $0x38] sm:$0xff]   ;;  %v3624_v52 = vld [vmem:[%s3868_s26 + $0x28] sm:$0xff]  }
 0x550   : > { %2796 = vrot.lane.b32.xlu0 %v2790_v31, %s3753_s15  ;;  %v2787_v60 = vpack.i.b16 %v2786_v23, %v2785_v29  ;;  %v2793_v34 = vpack.i.b16 %v2792_v4, %v2791_v58  ;;  %v3625_v29 = vld [vmem:[%s3868_s26 + $0x20] sm:$0xff]   ;;  %v3626_v58 = vld [vmem:[%s3868_s26 + $0x18] sm:$0xff]   ;;  %v3627_v31 = vld [vmem:[%s3868_s26 + $0x10] sm:$0xff]  }
 0x551   : > { %v3628_v23 = vld [vmem:[%s3868_s26 + $0x8] sm:$0xff]   ;;  %v3629_v4 = vld [vmem:[%s3868_s26] sm:$0xff]  }
 0x552   : > { %2794 = vrot.lane.b32.xlu1 %v2787_v60, %s3754_s18 }
 0x556   : > { %2798 = vrot.lane.b32.xlu1 %v2793_v34, %s3755_s24 }
 0x5c2   : > { %v2797_v35 = vpop.permute.xlu0 %2796 }
 0x5c4   : > { %v2795_v15 = vpop.permute.xlu1 %2794 }
 0x5c5   : > { %v2802_v38 = vsel %vm1585_vm3, %v2784_v33, %v2795_v15  ;;  %v3329_v33 = vld [vmem:[%s4384_s17] ss:$0 sm:$0xff] }
 0x5c6   : > { %v2805_v39 = vsel %vm2803_vm6, %v2802_v38, %v2797_v35 }
 0x5c8   : > { %v2799_v7 = vpop.permute.xlu1 %2798 }
 0x5c9   : > { %v2808_v62 = vsel %vm2806_vm7, %v2805_v39, %v2799_v7 }
 0x5ca   : > { %3538 = vmatmul.mubr.msk.bf16.vlgmr.msra.gmra.mxu1 %vm510_vm1, %v2808_v62 }
 0x5cb   : > { %3565 = vmatprep.mubr.msk.bf16.mxu1 %vm3746_vm2, %v3745_v18  ;;  %3550 = vmatpush3.bf16.msra.mxu1 %v3622_v28 }
 0x5cc   : > { %3551 = vmatprep.subr.bf16.mxu1 %v3745_v18 }
 0x5cf   : > { %3552 = vmatpush3.bf16.msra.mxu1 %v3623_v27 }
 0x5d0   : > { %3553 = vmatprep.subr.bf16.mxu1 %v3745_v18 }
 0x5d3   : > { %3554 = vmatpush3.bf16.msra.mxu1 %v3624_v52 }
 0x5d4   : > { %3555 = vmatprep.subr.bf16.mxu1 %v3745_v18 }
 0x5d7   : > { %3556 = vmatpush3.bf16.msra.mxu1 %v3625_v29 }
 0x5d8   : > { %3557 = vmatprep.subr.bf16.mxu1 %v3745_v18 }
 0x5db   : > { %3558 = vmatpush3.bf16.msra.mxu1 %v3626_v58 }
 0x5dc   : > { %3559 = vmatprep.subr.bf16.mxu1 %v3745_v18 }
 0x5df   : > { %3560 = vmatpush3.bf16.msra.mxu1 %v3627_v31 }
 0x5e0   : > { %3561 = vmatprep.subr.bf16.mxu1 %v3745_v18 }
 0x5e3   : > { %3562 = vmatpush3.bf16.msra.mxu1 %v3628_v23 }
 0x5e4   : > { %3563 = vmatprep.subr.bf16.mxu1 %v3745_v18 }
 0x5e7   : > { %3564 = vmatpush3.bf16.msra.mxu1 %v3629_v4 }
 0x68a   : > { %v2865_v42 = vpop.f32.mrf.mxu1 }
 0x68b   : > { %v2866_v26 = vadd.f32 %v2865_v42, %v2816_v41 }
 0x68c   : > { %v3539_v10 = vpop.f32.mrf.mxu1 }
 0x68d   : > { %v4300_v45 = vadd.f32 %v3691_v44, %v2866_v26 }
 0x68e   : > { %v2868_v46 = vpop.f32.mrf.mxu1 }
 0x68f   : > { %v2869_v32 = vadd.f32 %v2868_v46, %v2816_v41  ;;  %v2874_v47 = vsel %vm510_vm1, %v4300_v45, 0.0 }
 0x690   : > { %2875 = vadd.xlane.f32.xlu1 %v2874_v47  ;;  %v3540_v37 = vpop.f32.mrf.mxu1 }
 0x691   : > { %v4304_v43 = vadd.f32 %v3692_v20, %v2869_v32 }
 0x693   : > { %v2877_v30 = vsel %vm510_vm1, %v4304_v43, 0.0 }
 0x694   : > { %2878 = vadd.xlane.f32.xlu0 %v2877_v30 }
 0x719   : > { %v2876_v48 = vpop.xlane.xlu1 %2875 }
 0x71a   : > { %v2880_v49 = vmul.f32 0.03125, %v2876_v48 }
 0x71c   : > { %v2882_v50 = vsub.f32 %v4300_v45, %v2880_v49 }
 0x71d   : > { %v2879_v53 = vpop.xlane.xlu0 %2878 }
 0x71e   : > { %v2881_v54 = vmul.f32 0.03125, %v2879_v53  ;;  %v2884_v57 = vmul.f32 %v2882_v50, %v2882_v50  ;;  %v3333_v53 = vld [vmem:[%s3837_s21 + $0x8] ss:$0 sm:$0xff]  ;;  %s3693_s21 = scalar_lea.vmem %s3121_s19, 256 }
 0x71f   : > { %p3694_p7 = scmp.ne.s32.totalorder %s3121_s19, %s3693_s21  ;;  %p3701_p11 = scmp.lt.s32.totalorder %s3693_s21, %s3693_s21 }
 0x720   : > { %v2883_v59 = vsub.f32 %v4304_v43, %v2881_v54  ;;  %v2886_v61 = vsel %vm510_vm1, %v2884_v57, 0.0 }
 0x721   : > { %2887 = vadd.xlane.f32.xlu0 %v2886_v61  ;;  %p3695_p8 = pnand %p3694_p7, %p4343_p6  ;;  %p3702_p12 = por %p3701_p11, %p3700_p10 }
 0x722   : > { %v2885_v56 = vmul.f32 %v2883_v59, %v2883_v59 }
 0x723   : > { %p3696_p9 = pneg %p3695_p8 }
 0x724   : > { %v2889_v3 = vsel %vm510_vm1, %v2885_v56, 0.0 }
 0x725   : > { %2890 = vadd.xlane.f32.xlu1 %v2889_v3  ;;  %p3703_p13 = pnand %p3702_p12, %p3696_p9 }
 0x7aa   : > { %v2888_v1 = vpop.xlane.xlu0 %2887 }
 0x7ab   : > { %v2892_v2 = vmul.f32 0.03125, %v2888_v1 }
 0x7ad   : > { %v2894_v6 = vadd.f32 1e-05, %v2892_v2 }
 0x7ae   : > { %v2891_v19 = vpop.xlane.xlu1 %2890 }
 0x7af   : > { %3682 = vrsqrt.f32 %v2894_v6  ;;  %v2893_v8 = vmul.f32 0.03125, %v2891_v19 }
 0x7b1   : > { %v2895_v11 = vadd.f32 1e-05, %v2893_v8 }
 0x7b3   : > { %3684 = vrsqrt.f32 %v2895_v11 }
 0x7bc   : > { %v3683_v5 = vpop.eup %3682 }
 0x7bd   : > { %v2898_v51 = vmul.f32 %v3683_v5, %v2882_v50 }
 0x7bf   : > { %v2904_v16 = vmul.f32 %v2903_v13, %v2898_v51 }
 0x7c0   : > { %v3685_v9 = vpop.eup %3684 }
 0x7c1   : > { %v2899_v55 = vmul.f32 %v3685_v9, %v2883_v59  ;;  %v2910_v24 = vadd.f32 %v2909_v17, %v2904_v16 }
 0x7c3   : > { %v2905_v21 = vmul.f32 %v2903_v13, %v2899_v55 }
 0x7c5   : > { %v2911_v25 = vadd.f32 %v2909_v17, %v2905_v21 }
 0x7c7   : > { %v2912_v12 = vpack.c.bf16 %v2911_v25, %v2910_v24 }
 0x7c9   : > { %3546 = vmatmul.mubr.msk.bf16.vlgmr.msra.gmra.mxu0 %vm510_vm1, %v2912_v12 }
 0x889   : > { %v2972_v60 = vpop.f32.mrf.mxu0 }
 0x88a   : > { %v2973_v34 = vadd.f32 %v3329_v33, %v2972_v60 }
 0x88b   : > { %v3547_v15 = vpop.f32.mrf.mxu0 }
 0x88c   : > { %v2979_v38 = vmul.f32 %v2973_v34, %v2973_v34 }
 0x88d   : > { %v2975_v35 = vpop.f32.mrf.mxu0 }
 0x88e   : > { %v2981_v7 = vmul.f32 %v2979_v38, %v2973_v34  ;;  %v2976_v39 = vadd.f32 %v3329_v33, %v2975_v35 }
 0x88f   : > { %v3548_v62 = vpop.f32.mrf.mxu0 }
 0x890   : > { %v2983_v36 = vmul.f32 0.044715, %v2981_v7  ;;  %v2980_v40 = vmul.f32 %v2976_v39, %v2976_v39 }
 0x892   : > { %v2985_v41 = vadd.f32 %v2983_v36, %v2973_v34  ;;  %v2982_v42 = vmul.f32 %v2980_v40, %v2976_v39 }
 0x894   : > { %v2987_v26 = vmul.f32 0.7978846, %v2985_v41  ;;  %v2984_v18 = vmul.f32 0.044715, %v2982_v42 }
 0x896   : > { %3686 = vtanh.f32 %v2987_v26  ;;  %v2986_v10 = vadd.f32 %v2984_v18, %v2976_v39 }
 0x898   : > { %v2988_v44 = vmul.f32 0.7978846, %v2986_v10 }
 0x89a   : > { %3688 = vtanh.f32 %v2988_v44 }
 0x8a3   : > { %v3687_v46 = vpop.eup %3686 }
 0x8a4   : > { %v2991_v32 = vadd.f32 1.0, %v3687_v46 }
 0x8a6   : > { %v2993_v37 = vmul.f32 0.5, %v2991_v32 }
 0x8a7   : > { %v3689_v47 = vpop.eup %3688 }
 0x8a8   : > { %v2992_v20 = vadd.f32 1.0, %v3689_v47  ;;  %v2995_v48 = vmul.f32 %v2993_v37, %v2973_v34 }
 0x8aa   : > { %v2994_v30 = vmul.f32 0.5, %v2992_v20 }
 0x8ac   : > { %v2996_v49 = vmul.f32 %v2994_v30, %v2976_v39 }
 0x8ae   : > { %v2997_v50 = vpack.c.bf16 %v2996_v49, %v2995_v48 }
 0x8b0   : > { %3566 = vmatmul.mubr.bf16.vlgmr.msra.gmra.mxu1 %v2997_v50 }
 0x970   : > { %v3100_v54 = vpop.f32.mrf.mxu1 }
 0x971   : > { %v3101_v57 = vadd.f32 %v3333_v53, %v3100_v54 }
 0x972   : > { %v3567_v59 = vpop.f32.mrf.mxu1 }
 0x973   : > { %v3107_v61 = vadd.f32 %v3101_v57, %v4300_v45 }
 0x974   : > { %v3103_v56 = vpop.f32.mrf.mxu1 }
 0x975   : > { %3109 = vst.msk [vmem:[#allocation2] sm:$0xff] %vm510_vm1, %v3107_v61  ;;  %v3104_v3 = vadd.f32 %v3333_v53, %v3103_v56 }
 0x976   : > { %v3568_v63 = vpop.f32.mrf.mxu1 }
 0x977   : > { %v3108_v0 = vadd.f32 %v3104_v3, %v4304_v43 }
 0x979   : > { %3110 = vst.msk [vmem:[#allocation2 + $0x8] sm:$0xff] %vm510_vm1, %v3108_v0 }
 0x97a   : > { %3706 = shalt.err (!%p3703_p13)
}
 0x97b   : > { %s3757_s23 = smov 128  }
 0x97c   : > { %3570 = dma.vmem_to_hbm [thread:$0]  (%p4343_p6), %s3121_s19, 256, %s4379_s9, [#allocation3], %s3757_s23, %s3757_s23, %s3754_s18  }
 0x97d   : > { %3730 = dma.done.wait (%p4343_p6), [#allocation3], 256  }
 0x97e   : > { %3732 = vsyncadd (%p4343_p6), [#allocation3], 4294967040 }
 0x97f PF: > { %s20_s11 = sadd.s32 1, %s3743_s11   ;;  %s4387_s30 = smov %s3739_s10 }
 0x980   : > { %p17_p0 = scmp.ge.s32.totalorder %s20_s11, 4   ;;  %s4388_s10 = smov %s4390_s13 }
 0x982   :  { %19 = sbr.rel (!%p17_p0) target bundleno = 4 (0x4), region = 112 }
 0x987   :  { %3136 = vsyncpa [#allocation3], 1 }
 0x988   :  { %3138 = vsyncpa [#allocation3 + $0x1], 1 }

</bundles_post_ra>
